<compile_context>
chip_gen: v6e
topology: v6e:2x2x1
jax: 0.10.0
libtpu: 0.0.40
codegen_flags: <defaults>
</compile_context>

<pallas_src>
import functools

import jax
import jax.numpy as jnp
from jax.experimental import pallas as pl
from jax.experimental.pallas import tpu as pltpu


# -----------------------------------------------------------------------------
# Pallas kernel: fused GOAT pairwise attention (target + negative) for a tile
# of BT batches per grid step.
# -----------------------------------------------------------------------------
def _goat_fused_kernel(snh_ref, tnh_ref, nnh_ref, smask_ref, tmask_ref, nmask_ref,
                       sim_t_ref, sim_n_ref, satt_ref, tatt_ref, natt_ref,
                       srep_ref, trep_ref, nrep_ref):
    # snh_ref : (BT, Ns, D)  source neighborhood embeddings (shared operand)
    # tnh_ref : (BT, Nt, D)  target neighborhood embeddings
    # nnh_ref : (BT, Nn, D)  negative neighborhood embeddings
    # *mask   : (BT, N)      additive masks (0 valid / -1e9 padded)
    snh = snh_ref[...]
    tnh = tnh_ref[...]
    nnh = nnh_ref[...]

    _, ns, _ = snh.shape
    nt = tnh.shape[1]

    # ---- similarity matmuls on the MXU; snh loaded once, reused twice ------
    sim_t = jnp.tanh(jnp.einsum('bnd,bmd->bnm', snh, tnh,
                                preferred_element_type=jnp.float32))
    sim_n = jnp.tanh(jnp.einsum('bnd,bmd->bnm', snh, nnh,
                                preferred_element_type=jnp.float32))
    sim_t_ref[...] = sim_t
    sim_n_ref[...] = sim_n

    # ---- source-side attention: softmax over Ns (lane axis of (BT, Ns)) ----
    sv = jnp.sum(sim_t, axis=2) * (1.0 / nt) + smask_ref[...]       # (BT, Ns)
    sv = sv - jnp.max(sv, axis=1, keepdims=True)
    es = jnp.exp(sv)
    satt = es * pl.reciprocal(jnp.sum(es, axis=1, keepdims=True), approx=True)
    satt_ref[...] = satt

    # ---- target-side attention: softmax over Nt ----------------------------
    tv = jnp.sum(sim_t, axis=1) * (1.0 / ns) + tmask_ref[...]       # (BT, Nt)
    tv = tv - jnp.max(tv, axis=1, keepdims=True)
    et = jnp.exp(tv)
    tatt = et * pl.reciprocal(jnp.sum(et, axis=1, keepdims=True), approx=True)
    tatt_ref[...] = tatt

    # ---- negative-side attention: softmax over Nn ---------------------------
    nv = jnp.sum(sim_n, axis=1) * (1.0 / ns) + nmask_ref[...]       # (BT, Nn)
    nv = nv - jnp.max(nv, axis=1, keepdims=True)
    en = jnp.exp(nv)
    natt = en * pl.reciprocal(jnp.sum(en, axis=1, keepdims=True), approx=True)
    natt_ref[...] = natt

    # ---- attention-weighted representations on the MXU ---------------------
    srep_ref[...] = jnp.einsum('bqn,bnd->bqd', satt[:, None, :], snh,
                               preferred_element_type=jnp.float32)[:, 0, :]
    trep_ref[...] = jnp.einsum('bqn,bnd->bqd', tatt[:, None, :], tnh,
                               preferred_element_type=jnp.float32)[:, 0, :]
    nrep_ref[...] = jnp.einsum('bqn,bnd->bqd', natt[:, None, :], nnh,
                               preferred_element_type=jnp.float32)[:, 0, :]


def goat_pairwise_fused(snh, tnh, nnh, smask, tmask, nmask, *, batch_tile=8):
    """Fused GOAT attention for target + negative sides, batch-tiled.

    snh   : (B, Ns, D) f32     tnh : (B, Nt, D) f32     nnh : (B, Nn, D) f32
    smask : (B, Ns) f32        tmask : (B, Nt) f32      nmask : (B, Nn) f32
    Returns (sim_t, sim_n, satt, tatt, natt, srep, trep, nrep) with B rows.
    """
    B, Ns, D = snh.shape
    Nt = tnh.shape[1]
    Nn = nnh.shape[1]

    if B <= batch_tile:
        bt = B                       # block == full batch dim (always legal)
    else:
        assert batch_tile % 8 == 0, "batch_tile must be a multiple of 8"
        bt = batch_tile
    b_pad = pl.cdiv(B, bt) * bt

    def pad_b(x):
        if x.shape[0] == b_pad:
            return x
        pads = ((0, b_pad - x.shape[0]),) + ((0, 0),) * (x.ndim - 1)
        return jnp.pad(x, pads)

    snh_p, tnh_p, nnh_p = pad_b(snh), pad_b(tnh), pad_b(nnh)
    smask_p, tmask_p, nmask_p = pad_b(smask), pad_b(tmask), pad_b(nmask)

    grid = (b_pad // bt,)

    out_shape = (
        jax.ShapeDtypeStruct((b_pad, Ns, Nt), jnp.float32),   # sim_t
        jax.ShapeDtypeStruct((b_pad, Ns, Nn), jnp.float32),   # sim_n
        jax.ShapeDtypeStruct((b_pad, Ns), jnp.float32),       # satt (lane-dense)
        jax.ShapeDtypeStruct((b_pad, Nt), jnp.float32),       # tatt
        jax.ShapeDtypeStruct((b_pad, Nn), jnp.float32),       # natt
        jax.ShapeDtypeStruct((b_pad, D), jnp.float32),        # srep
        jax.ShapeDtypeStruct((b_pad, D), jnp.float32),        # trep
        jax.ShapeDtypeStruct((b_pad, D), jnp.float32),        # nrep
    )

    outs = pl.pallas_call(
        _goat_fused_kernel,
        out_shape=out_shape,
        grid=grid,
        in_specs=[
            pl.BlockSpec((bt, Ns, D), lambda b: (b, 0, 0)),
            pl.BlockSpec((bt, Nt, D), lambda b: (b, 0, 0)),
            pl.BlockSpec((bt, Nn, D), lambda b: (b, 0, 0)),
            pl.BlockSpec((bt, Ns), lambda b: (b, 0)),
            pl.BlockSpec((bt, Nt), lambda b: (b, 0)),
            pl.BlockSpec((bt, Nn), lambda b: (b, 0)),
        ],
        out_specs=(
            pl.BlockSpec((bt, Ns, Nt), lambda b: (b, 0, 0)),
            pl.BlockSpec((bt, Ns, Nn), lambda b: (b, 0, 0)),
            pl.BlockSpec((bt, Ns), lambda b: (b, 0)),
            pl.BlockSpec((bt, Nt), lambda b: (b, 0)),
            pl.BlockSpec((bt, Nn), lambda b: (b, 0)),
            pl.BlockSpec((bt, D), lambda b: (b, 0)),
            pl.BlockSpec((bt, D), lambda b: (b, 0)),
            pl.BlockSpec((bt, D), lambda b: (b, 0)),
        ),
        compiler_params=pltpu.CompilerParams(
            dimension_semantics=("parallel",),
            # Blocks here are tiny; 32 MiB is safely under every generation's
            # physical VMEM (v7x: 64 MiB) while leaving double-buffer headroom.
            vmem_limit_bytes=32 * 1024 * 1024,
        ),
    )(snh_p, tnh_p, nnh_p, smask_p, tmask_p, nmask_p)

    if b_pad != B:
        outs = tuple(o[:B] for o in outs)
    return outs


# -----------------------------------------------------------------------------
# Glue: embedding table, gather, dropout, shape plumbing
# -----------------------------------------------------------------------------
def make_embedding_table(key, num_nodes, emb_dim):
    # nn.Embedding(num_nodes+1, emb_dim, padding_idx=0) then xavier_uniform_
    # (xavier overwrites the padding row, so no explicit zeroing is needed).
    fan_in, fan_out = num_nodes + 1, emb_dim
    bound = jnp.sqrt(6.0 / (fan_in + fan_out))
    return jax.random.uniform(key, (num_nodes + 1, emb_dim),
                              minval=-bound, maxval=bound, dtype=jnp.float32)


def _dropout(x, rate, key):
    # TODO(synk): dropout is elementwise glue kept in plain JAX; torch RNG
    # cannot be matched bit-for-bit anyway.
    keep = jax.random.bernoulli(key, 1.0 - rate, x.shape)
    return jnp.where(keep, x / (1.0 - rate), jnp.zeros_like(x))


def goat_forward(emb_table, *, training, source, target, negative,
                 source_neighborhood, target_neighborhood,
                 negative_neighborhood, source_mask, target_mask,
                 negative_mask, rate, dropout_key, batch_tile=8):
    """Reproduces GOAT.forward; returns the attributes the torch module sets."""
    embed = functools.partial(jnp.take, emb_table, axis=0)
    keys = jax.random.split(dropout_key, 6)   # independent mask per tensor

    def global_embedding(ix, drop, key):
        e = embed(ix)                                   # (..., D)
        if drop:
            e = _dropout(e, rate, key)
        return e

    source_emb = global_embedding(source, training, keys[0])          # (B, D)
    out = {"source_emb": source_emb}
    if target is None:
        return out

    target_emb = global_embedding(target, training, keys[1])          # (B, D)
    snh = global_embedding(source_neighborhood, training, keys[2])    # (B, Ns, D)
    tnh = global_embedding(target_neighborhood, training, keys[3])    # (B, Nt, D)

    smask = source_mask.astype(jnp.float32)                           # (B, Ns)
    tmask = target_mask.astype(jnp.float32)                           # (B, Nt)

    has_negative = negative is not None
    if has_negative:
        # TODO(synk): torch's _noise_forward passes training=True to
        # GlobalEmbedding but nn.Dropout is only active when the module is in
        # train mode; we gate on `training` as the module-wide flag.
        neg_emb = global_embedding(negative, training, keys[4])           # (B, D)
        nnh = global_embedding(negative_neighborhood, training, keys[5])  # (B, Nn, D)
        nmask = negative_mask.astype(jnp.float32)                         # (B, Nn)
    else:
        neg_emb = None
        nnh = tnh                              # dummy operand; outputs dropped
        nmask = jnp.zeros_like(tmask)

    sim_t, sim_n, satt, tatt, natt, srep, trep, nrep = goat_pairwise_fused(
        snh, tnh, nnh, smask, tmask, nmask, batch_tile=batch_tile)

    out.update({
        "target_emb": target_emb,
        # torch GlobalEmbedding returns (B, D, N)
        "source_nh_emb": jnp.transpose(snh, (0, 2, 1)),
        "target_nh_emb": jnp.transpose(tnh, (0, 2, 1)),
        "source_target_sim": sim_t,                                   # (B, Ns, Nt)
        "source_attention_vec": satt[:, :, None],                     # (B, Ns, 1)
        "target_attention_vec": tatt[:, :, None],                     # (B, Nt, 1)
        "source_rep": srep,                                           # (B, D)
        "target_rep": trep,                                           # (B, D)
    })
    if has_negative:
        out.update({
            "negative_emb": neg_emb,
            "negative_nh_emb": jnp.transpose(nnh, (0, 2, 1)),
            "source_neg_sim": sim_n,                                  # (B, Ns, Nn)
            "neg_attention_vec": natt[:, :, None],                    # (B, Nn, 1)
            "negative_rep": nrep,                                     # (B, D)
        })
    return out


# -----------------------------------------------------------------------------
# Pure-JAX reference (mirrors the torch math) for a sanity check
# -----------------------------------------------------------------------------
def _reference(snh, tnh, nnh, smask, tmask, nmask):
    sim_t = jnp.tanh(jnp.einsum("bnd,bmd->bnm", snh, tnh))
    sv = jnp.mean(sim_t, axis=-1) + smask
    satt = jax.nn.softmax(sv, axis=-1)
    tv = jnp.mean(sim_t, axis=1) + tmask
    tatt = jax.nn.softmax(tv, axis=-1)
    srep = jnp.einsum("bn,bnd->bd", satt, snh)
    trep = jnp.einsum("bm,bmd->bd", tatt, tnh)

    sim_n = jnp.tanh(jnp.einsum("bnd,bmd->bnm", snh, nnh))
    nv = jnp.mean(sim_n, axis=1) + nmask
    natt = jax.nn.softmax(nv, axis=-1)
    nrep = jnp.einsum("bm,bmd->bd", natt, nnh)
    return sim_t, sim_n, satt, tatt, natt, srep, trep, nrep


if __name__ == "__main__":
    num_nodes, emb_dim, rate = 16, 32, 0.5
    B, Ns, Nt, Nn = 16, 8, 8, 8     # B=16 with batch_tile=8 -> 2 parallel grid steps

    root = jax.random.PRNGKey(0)
    k_tab, k_s, k_t, k_n, k_snh, k_tnh, k_nnh, k_drop = jax.random.split(root, 8)

    emb_table = make_embedding_table(k_tab, num_nodes, emb_dim)

    source = jax.random.randint(k_s, (B,), 1, num_nodes + 1, dtype=jnp.int32)
    target = jax.random.randint(k_t, (B,), 1, num_nodes + 1, dtype=jnp.int32)
    negative = jax.random.randint(k_n, (B,), 1, num_nodes + 1, dtype=jnp.int32)
    source_nh = jax.random.randint(k_snh, (B, Ns), 0, num_nodes + 1, dtype=jnp.int32)
    target_nh = jax.random.randint(k_tnh, (B, Nt), 0, num_nodes + 1, dtype=jnp.int32)
    negative_nh = jax.random.randint(k_nnh, (B, Nn), 0, num_nodes + 1, dtype=jnp.int32)

    # additive masks: 0 for valid slots, -1e9 for padded slots
    source_mask = jnp.where(source_nh == 0, -1e9, 0.0).astype(jnp.float32)
    target_mask = jnp.where(target_nh == 0, -1e9, 0.0).astype(jnp.float32)
    negative_mask = jnp.where(negative_nh == 0, -1e9, 0.0).astype(jnp.float32)

    out = goat_forward(
        emb_table, training=False,
        source=source, target=target, negative=negative,
        source_neighborhood=source_nh, target_neighborhood=target_nh,
        negative_neighborhood=negative_nh,
        source_mask=source_mask, target_mask=target_mask,
        negative_mask=negative_mask,
        rate=rate, dropout_key=k_drop, batch_tile=8)
    out = jax.block_until_ready(out)

    # sanity check against a pure-JAX reference (same gathered embeddings)
    snh = jnp.take(emb_table, source_nh, axis=0)
    tnh = jnp.take(emb_table, target_nh, axis=0)
    nnh = jnp.take(emb_table, negative_nh, axis=0)
    sim_t_r, sim_n_r, satt_r, tatt_r, natt_r, srep_r, trep_r, nrep_r = _reference(
        snh, tnh, nnh, source_mask, target_mask, negative_mask)

    # sims are exact matmul+tanh; attentions/reps use the approx EUP reciprocal
    assert jnp.allclose(out["source_target_sim"], sim_t_r, atol=1e-5)
    assert jnp.allclose(out["source_neg_sim"], sim_n_r, atol=1e-5)
    assert jnp.allclose(out["source_attention_vec"][:, :, 0], satt_r, atol=2e-3)
    assert jnp.allclose(out["target_attention_vec"][:, :, 0], tatt_r, atol=2e-3)
    assert jnp.allclose(out["neg_attention_vec"][:, :, 0], natt_r, atol=2e-3)
    assert jnp.allclose(out["source_rep"], srep_r, atol=2e-3)
    assert jnp.allclose(out["target_rep"], trep_r, atol=2e-3)
    assert jnp.allclose(out["negative_rep"], nrep_r, atol=2e-3)

    print("KERNEL_OK")
</pallas_src>

<mosaic_0001>
module attributes {stable_mosaic.version = 11 : i64} {
  func.func @_goat_fused_kernel(%arg0: i32, %arg1: memref<8x8x32xf32, #tpu.memory_space<vmem>>, %arg2: memref<8x8x32xf32, #tpu.memory_space<vmem>>, %arg3: memref<8x8x32xf32, #tpu.memory_space<vmem>>, %arg4: memref<8x8xf32, #tpu.memory_space<vmem>>, %arg5: memref<8x8xf32, #tpu.memory_space<vmem>>, %arg6: memref<8x8xf32, #tpu.memory_space<vmem>>, %arg7: memref<8x8x8xf32, #tpu.memory_space<vmem>>, %arg8: memref<8x8x8xf32, #tpu.memory_space<vmem>>, %arg9: memref<8x8xf32, #tpu.memory_space<vmem>>, %arg10: memref<8x8xf32, #tpu.memory_space<vmem>>, %arg11: memref<8x8xf32, #tpu.memory_space<vmem>>, %arg12: memref<8x32xf32, #tpu.memory_space<vmem>>, %arg13: memref<8x32xf32, #tpu.memory_space<vmem>>, %arg14: memref<8x32xf32, #tpu.memory_space<vmem>>) attributes {dimension_semantics = [#tpu.dimension_semantics<parallel>], iteration_bounds = array<i64: 2>, scalar_prefetch = 0 : i64, scratch_operands = 0 : i64, tpu.core_type = #tpu.core_type<tc>, window_params = [{transform_indices = @transform_0, window_bounds = array<i64: 8, 8, 32>}, {transform_indices = @transform_1, window_bounds = array<i64: 8, 8, 32>}, {transform_indices = @transform_2, window_bounds = array<i64: 8, 8, 32>}, {transform_indices = @transform_3, window_bounds = array<i64: 8, 8>}, {transform_indices = @transform_4, window_bounds = array<i64: 8, 8>}, {transform_indices = @transform_5, window_bounds = array<i64: 8, 8>}, {transform_indices = @transform_6, window_bounds = array<i64: 8, 8, 8>}, {transform_indices = @transform_7, window_bounds = array<i64: 8, 8, 8>}, {transform_indices = @transform_8, window_bounds = array<i64: 8, 8>}, {transform_indices = @transform_9, window_bounds = array<i64: 8, 8>}, {transform_indices = @transform_10, window_bounds = array<i64: 8, 8>}, {transform_indices = @transform_11, window_bounds = array<i64: 8, 32>}, {transform_indices = @transform_12, window_bounds = array<i64: 8, 32>}, {transform_indices = @transform_13, window_bounds = array<i64: 8, 32>}]} {
    %c0 = arith.constant 0 : index
    %c0_0 = arith.constant 0 : index
    %c0_1 = arith.constant 0 : index
    %0 = vector.load %arg1[%c0, %c0_0, %c0_1] : memref<8x8x32xf32, #tpu.memory_space<vmem>>, vector<8x8x32xf32>
    %c0_2 = arith.constant 0 : index
    %c0_3 = arith.constant 0 : index
    %c0_4 = arith.constant 0 : index
    %1 = vector.load %arg2[%c0_2, %c0_3, %c0_4] : memref<8x8x32xf32, #tpu.memory_space<vmem>>, vector<8x8x32xf32>
    %c0_5 = arith.constant 0 : index
    %c0_6 = arith.constant 0 : index
    %c0_7 = arith.constant 0 : index
    %2 = vector.load %arg3[%c0_5, %c0_6, %c0_7] : memref<8x8x32xf32, #tpu.memory_space<vmem>>, vector<8x8x32xf32>
    "tpu.trace_start"() <{level = 10 : i32, message = "bnd,bmd->bnm"}> : () -> ()
    %cst = arith.constant dense<0.000000e+00> : vector<8x8x8xf32>
    %3 = tpu.matmul %0, %1, %cst {dimension_numbers = #tpu.dot_dimension_numbers<[2], [2], [1], [1], [0, 0, 0, 1, 1, 1], [0], [0]>} : vector<8x8x32xf32>, vector<8x8x32xf32>, vector<8x8x8xf32> -> vector<8x8x8xf32>
    "tpu.trace_stop"() : () -> ()
    %4 = math.tanh %3 : vector<8x8x8xf32>
    "tpu.trace_start"() <{level = 10 : i32, message = "bnd,bmd->bnm"}> : () -> ()
    %cst_8 = arith.constant dense<0.000000e+00> : vector<8x8x8xf32>
    %5 = tpu.matmul %0, %2, %cst_8 {dimension_numbers = #tpu.dot_dimension_numbers<[2], [2], [1], [1], [0, 0, 0, 1, 1, 1], [0], [0]>} : vector<8x8x32xf32>, vector<8x8x32xf32>, vector<8x8x8xf32> -> vector<8x8x8xf32>
    "tpu.trace_stop"() : () -> ()
    %6 = math.tanh %5 : vector<8x8x8xf32>
    %c0_9 = arith.constant 0 : index
    %c0_10 = arith.constant 0 : index
    %c0_11 = arith.constant 0 : index
    %7 = vector.load %arg7[%c0_9, %c0_10, %c0_11] : memref<8x8x8xf32, #tpu.memory_space<vmem>>, vector<8x8x8xf32>
    tpu.vector_store %arg7[%c0_9, %c0_10, %c0_11], %4 {strides = array<i32>} : memref<8x8x8xf32, #tpu.memory_space<vmem>>, vector<8x8x8xf32>,
    %c0_12 = arith.constant 0 : index
    %c0_13 = arith.constant 0 : index
    %c0_14 = arith.constant 0 : index
    %8 = vector.load %arg8[%c0_12, %c0_13, %c0_14] : memref<8x8x8xf32, #tpu.memory_space<vmem>>, vector<8x8x8xf32>
    tpu.vector_store %arg8[%c0_12, %c0_13, %c0_14], %6 {strides = array<i32>} : memref<8x8x8xf32, #tpu.memory_space<vmem>>, vector<8x8x8xf32>,
    %cst_15 = arith.constant dense<0.000000e+00> : vector<8x8xf32>
    %9 = vector.multi_reduction <add>, %4, %cst_15 [2] : vector<8x8x8xf32> to vector<8x8xf32>
    %cst_16 = arith.constant 1.250000e-01 : f32
    %10 = vector.broadcast %cst_16 : f32 to vector<8x8xf32>
    %11 = arith.mulf %9, %10 : vector<8x8xf32>
    %c0_17 = arith.constant 0 : index
    %c0_18 = arith.constant 0 : index
    %12 = vector.load %arg4[%c0_17, %c0_18] : memref<8x8xf32, #tpu.memory_space<vmem>>, vector<8x8xf32>
    %13 = arith.addf %11, %12 : vector<8x8xf32>
    %cst_19 = arith.constant dense<0xFF800000> : vector<8xf32>
    %14 = vector.multi_reduction <maximumf>, %13, %cst_19 [1] : vector<8x8xf32> to vector<8xf32>
    %15 = vector.shape_cast %14 : vector<8xf32> to vector<8x1xf32>
    %16 = vector.broadcast %15 : vector<8x1xf32> to vector<8x8xf32>
    %17 = arith.subf %13, %16 : vector<8x8xf32>
    %18 = math.exp %17 : vector<8x8xf32>
    %cst_20 = arith.constant dense<0.000000e+00> : vector<8xf32>
    %19 = vector.multi_reduction <add>, %18, %cst_20 [1] : vector<8x8xf32> to vector<8xf32>
    %20 = vector.shape_cast %19 : vector<8xf32> to vector<8x1xf32>
    %21 = tpu.reciprocal %20 {approx = true} : vector<8x1xf32> -> vector<8x1xf32>
    %22 = vector.broadcast %21 : vector<8x1xf32> to vector<8x8xf32>
    %23 = arith.mulf %18, %22 : vector<8x8xf32>
    %c0_21 = arith.constant 0 : index
    %c0_22 = arith.constant 0 : index
    %24 = vector.load %arg9[%c0_21, %c0_22] : memref<8x8xf32, #tpu.memory_space<vmem>>, vector<8x8xf32>
    tpu.vector_store %arg9[%c0_21, %c0_22], %23 {strides = array<i32>} : memref<8x8xf32, #tpu.memory_space<vmem>>, vector<8x8xf32>,
    %cst_23 = arith.constant dense<0.000000e+00> : vector<8x8xf32>
    %25 = vector.multi_reduction <add>, %4, %cst_23 [1] : vector<8x8x8xf32> to vector<8x8xf32>
    %cst_24 = arith.constant 1.250000e-01 : f32
    %26 = vector.broadcast %cst_24 : f32 to vector<8x8xf32>
    %27 = arith.mulf %25, %26 : vector<8x8xf32>
    %c0_25 = arith.constant 0 : index
    %c0_26 = arith.constant 0 : index
    %28 = vector.load %arg5[%c0_25, %c0_26] : memref<8x8xf32, #tpu.memory_space<vmem>>, vector<8x8xf32>
    %29 = arith.addf %27, %28 : vector<8x8xf32>
    %cst_27 = arith.constant dense<0xFF800000> : vector<8xf32>
    %30 = vector.multi_reduction <maximumf>, %29, %cst_27 [1] : vector<8x8xf32> to vector<8xf32>
    %31 = vector.shape_cast %30 : vector<8xf32> to vector<8x1xf32>
    %32 = vector.broadcast %31 : vector<8x1xf32> to vector<8x8xf32>
    %33 = arith.subf %29, %32 : vector<8x8xf32>
    %34 = math.exp %33 : vector<8x8xf32>
    %cst_28 = arith.constant dense<0.000000e+00> : vector<8xf32>
    %35 = vector.multi_reduction <add>, %34, %cst_28 [1] : vector<8x8xf32> to vector<8xf32>
    %36 = vector.shape_cast %35 : vector<8xf32> to vector<8x1xf32>
    %37 = tpu.reciprocal %36 {approx = true} : vector<8x1xf32> -> vector<8x1xf32>
    %38 = vector.broadcast %37 : vector<8x1xf32> to vector<8x8xf32>
    %39 = arith.mulf %34, %38 : vector<8x8xf32>
    %c0_29 = arith.constant 0 : index
    %c0_30 = arith.constant 0 : index
    %40 = vector.load %arg10[%c0_29, %c0_30] : memref<8x8xf32, #tpu.memory_space<vmem>>, vector<8x8xf32>
    tpu.vector_store %arg10[%c0_29, %c0_30], %39 {strides = array<i32>} : memref<8x8xf32, #tpu.memory_space<vmem>>, vector<8x8xf32>,
    %cst_31 = arith.constant dense<0.000000e+00> : vector<8x8xf32>
    %41 = vector.multi_reduction <add>, %6, %cst_31 [1] : vector<8x8x8xf32> to vector<8x8xf32>
    %cst_32 = arith.constant 1.250000e-01 : f32
    %42 = vector.broadcast %cst_32 : f32 to vector<8x8xf32>
    %43 = arith.mulf %41, %42 : vector<8x8xf32>
    %c0_33 = arith.constant 0 : index
    %c0_34 = arith.constant 0 : index
    %44 = vector.load %arg6[%c0_33, %c0_34] : memref<8x8xf32, #tpu.memory_space<vmem>>, vector<8x8xf32>
    %45 = arith.addf %43, %44 : vector<8x8xf32>
    %cst_35 = arith.constant dense<0xFF800000> : vector<8xf32>
    %46 = vector.multi_reduction <maximumf>, %45, %cst_35 [1] : vector<8x8xf32> to vector<8xf32>
    %47 = vector.shape_cast %46 : vector<8xf32> to vector<8x1xf32>
    %48 = vector.broadcast %47 : vector<8x1xf32> to vector<8x8xf32>
    %49 = arith.subf %45, %48 : vector<8x8xf32>
    %50 = math.exp %49 : vector<8x8xf32>
    %cst_36 = arith.constant dense<0.000000e+00> : vector<8xf32>
    %51 = vector.multi_reduction <add>, %50, %cst_36 [1] : vector<8x8xf32> to vector<8xf32>
    %52 = vector.shape_cast %51 : vector<8xf32> to vector<8x1xf32>
    %53 = tpu.reciprocal %52 {approx = true} : vector<8x1xf32> -> vector<8x1xf32>
    %54 = vector.broadcast %53 : vector<8x1xf32> to vector<8x8xf32>
    %55 = arith.mulf %50, %54 : vector<8x8xf32>
    %c0_37 = arith.constant 0 : index
    %c0_38 = arith.constant 0 : index
    %56 = vector.load %arg11[%c0_37, %c0_38] : memref<8x8xf32, #tpu.memory_space<vmem>>, vector<8x8xf32>
    tpu.vector_store %arg11[%c0_37, %c0_38], %55 {strides = array<i32>} : memref<8x8xf32, #tpu.memory_space<vmem>>, vector<8x8xf32>,
    %57 = vector.shape_cast %23 : vector<8x8xf32> to vector<8x1x8xf32>
    "tpu.trace_start"() <{level = 10 : i32, message = "bqn,bnd->bqd"}> : () -> ()
    %cst_39 = arith.constant dense<0.000000e+00> : vector<8x1x32xf32>
    %58 = tpu.matmul %57, %0, %cst_39 {dimension_numbers = #tpu.dot_dimension_numbers<[2], [1], [1], [2], [0, 0, 0, 1, 1, 2], [0], [0]>} : vector<8x1x8xf32>, vector<8x8x32xf32>, vector<8x1x32xf32> -> vector<8x1x32xf32>
    "tpu.trace_stop"() : () -> ()
    %59 = vector.shape_cast %58 : vector<8x1x32xf32> to vector<8x32xf32>
    %c0_40 = arith.constant 0 : index
    %c0_41 = arith.constant 0 : index
    %60 = vector.load %arg12[%c0_40, %c0_41] : memref<8x32xf32, #tpu.memory_space<vmem>>, vector<8x32xf32>
    tpu.vector_store %arg12[%c0_40, %c0_41], %59 {strides = array<i32>} : memref<8x32xf32, #tpu.memory_space<vmem>>, vector<8x32xf32>,
    %61 = vector.shape_cast %39 : vector<8x8xf32> to vector<8x1x8xf32>
    "tpu.trace_start"() <{level = 10 : i32, message = "bqn,bnd->bqd"}> : () -> ()
    %cst_42 = arith.constant dense<0.000000e+00> : vector<8x1x32xf32>
    %62 = tpu.matmul %61, %1, %cst_42 {dimension_numbers = #tpu.dot_dimension_numbers<[2], [1], [1], [2], [0, 0, 0, 1, 1, 2], [0], [0]>} : vector<8x1x8xf32>, vector<8x8x32xf32>, vector<8x1x32xf32> -> vector<8x1x32xf32>
    "tpu.trace_stop"() : () -> ()
    %63 = vector.shape_cast %62 : vector<8x1x32xf32> to vector<8x32xf32>
    %c0_43 = arith.constant 0 : index
    %c0_44 = arith.constant 0 : index
    %64 = vector.load %arg13[%c0_43, %c0_44] : memref<8x32xf32, #tpu.memory_space<vmem>>, vector<8x32xf32>
    tpu.vector_store %arg13[%c0_43, %c0_44], %63 {strides = array<i32>} : memref<8x32xf32, #tpu.memory_space<vmem>>, vector<8x32xf32>,
    %65 = vector.shape_cast %55 : vector<8x8xf32> to vector<8x1x8xf32>
    "tpu.trace_start"() <{level = 10 : i32, message = "bqn,bnd->bqd"}> : () -> ()
    %cst_45 = arith.constant dense<0.000000e+00> : vector<8x1x32xf32>
    %66 = tpu.matmul %65, %2, %cst_45 {dimension_numbers = #tpu.dot_dimension_numbers<[2], [1], [1], [2], [0, 0, 0, 1, 1, 2], [0], [0]>} : vector<8x1x8xf32>, vector<8x8x32xf32>, vector<8x1x32xf32> -> vector<8x1x32xf32>
    "tpu.trace_stop"() : () -> ()
    %67 = vector.shape_cast %66 : vector<8x1x32xf32> to vector<8x32xf32>
    %c0_46 = arith.constant 0 : index
    %c0_47 = arith.constant 0 : index
    %68 = vector.load %arg14[%c0_46, %c0_47] : memref<8x32xf32, #tpu.memory_space<vmem>>, vector<8x32xf32>
    tpu.vector_store %arg14[%c0_46, %c0_47], %67 {strides = array<i32>} : memref<8x32xf32, #tpu.memory_space<vmem>>, vector<8x32xf32>,
    return
  }
  func.func @transform_0(%arg0: i32) -> (i32, i32, i32) {
    %c0_i32 = arith.constant 0 : i32
    %c0_i32_0 = arith.constant 0 : i32
    %c0_i32_1 = arith.constant 0 : i32
    return %arg0, %c0_i32, %c0_i32_0 : i32, i32, i32
  }
  func.func @transform_1(%arg0: i32) -> (i32, i32, i32) {
    %c0_i32 = arith.constant 0 : i32
    %c0_i32_0 = arith.constant 0 : i32
    %c0_i32_1 = arith.constant 0 : i32
    return %arg0, %c0_i32, %c0_i32_0 : i32, i32, i32
  }
  func.func @transform_2(%arg0: i32) -> (i32, i32, i32) {
    %c0_i32 = arith.constant 0 : i32
    %c0_i32_0 = arith.constant 0 : i32
    %c0_i32_1 = arith.constant 0 : i32
    return %arg0, %c0_i32, %c0_i32_0 : i32, i32, i32
  }
  func.func @transform_3(%arg0: i32) -> (i32, i32) {
    %c0_i32 = arith.constant 0 : i32
    %c0_i32_0 = arith.constant 0 : i32
    return %arg0, %c0_i32 : i32, i32
  }
  func.func @transform_4(%arg0: i32) -> (i32, i32) {
    %c0_i32 = arith.constant 0 : i32
    %c0_i32_0 = arith.constant 0 : i32
    return %arg0, %c0_i32 : i32, i32
  }
  func.func @transform_5(%arg0: i32) -> (i32, i32) {
    %c0_i32 = arith.constant 0 : i32
    %c0_i32_0 = arith.constant 0 : i32
    return %arg0, %c0_i32 : i32, i32
  }
  func.func @transform_6(%arg0: i32) -> (i32, i32, i32) {
    %c0_i32 = arith.constant 0 : i32
    %c0_i32_0 = arith.constant 0 : i32
    %c0_i32_1 = arith.constant 0 : i32
    return %arg0, %c0_i32, %c0_i32_0 : i32, i32, i32
  }
  func.func @transform_7(%arg0: i32) -> (i32, i32, i32) {
    %c0_i32 = arith.constant 0 : i32
    %c0_i32_0 = arith.constant 0 : i32
    %c0_i32_1 = arith.constant 0 : i32
    return %arg0, %c0_i32, %c0_i32_0 : i32, i32, i32
  }
  func.func @transform_8(%arg0: i32) -> (i32, i32) {
    %c0_i32 = arith.constant 0 : i32
    %c0_i32_0 = arith.constant 0 : i32
    return %arg0, %c0_i32 : i32, i32
  }
  func.func @transform_9(%arg0: i32) -> (i32, i32) {
    %c0_i32 = arith.constant 0 : i32
    %c0_i32_0 = arith.constant 0 : i32
    return %arg0, %c0_i32 : i32, i32
  }
  func.func @transform_10(%arg0: i32) -> (i32, i32) {
    %c0_i32 = arith.constant 0 : i32
    %c0_i32_0 = arith.constant 0 : i32
    return %arg0, %c0_i32 : i32, i32
  }
  func.func @transform_11(%arg0: i32) -> (i32, i32) {
    %c0_i32 = arith.constant 0 : i32
    %c0_i32_0 = arith.constant 0 : i32
    return %arg0, %c0_i32 : i32, i32
  }
  func.func @transform_12(%arg0: i32) -> (i32, i32) {
    %c0_i32 = arith.constant 0 : i32
    %c0_i32_0 = arith.constant 0 : i32
    return %arg0, %c0_i32 : i32, i32
  }
  func.func @transform_13(%arg0: i32) -> (i32, i32) {
    %c0_i32 = arith.constant 0 : i32
    %c0_i32_0 = arith.constant 0 : i32
    return %arg0, %c0_i32 : i32, i32
  }
}

</mosaic_0001>

<bundles_post_ra>
// kernel: tpu_custom_call.1
= control target key start
LH: loop header
LB: loop body
LE: loop exit
PB: predicated region body
PF: predicated region fallthrough
CT: control target
= control target key end

     0   :  { %s6967_s0 = inlined_call_operand.hbm [shape: f32[16,8,32], index: 0, kind: input, shape index: {}]   ;;  %s6968_s1 = inlined_call_operand.hbm [shape: f32[16,8,32], index: 1, kind: input, shape index: {}]   ;;  %s6969_s2 = inlined_call_operand.hbm [shape: f32[16,8,32], index: 2, kind: input, shape index: {}]   ;;  %s6970_s3 = inlined_call_operand.vmem [shape: f32[16,8], index: 3, kind: input, shape index: {}]   ;;  %s6971_s4 = inlined_call_operand.vmem [shape: f32[16,8], index: 4, kind: input, shape index: {}]   ;;  %s6972_s5 = inlined_call_operand.vmem [shape: f32[16,8], index: 5, kind: input, shape index: {}]   ;;  %s6973_s6 = inlined_call_operand.vmem [shape: f32[16,8,8], index: 6, kind: output, shape index: {0}]   ;;  %s6974_s7 = inlined_call_operand.vmem [shape: f32[16,8,8], index: 7, kind: output, shape index: {1}]   ;;  %s6975_s8 = inlined_call_operand.vmem [shape: f32[16,8], index: 8, kind: output, shape index: {2}]   ;;  %s6976_s9 = inlined_call_operand.vmem [shape: f32[16,8], index: 9, kind: output, shape index: {3}]   ;;  %s6977_s10 = inlined_call_operand.vmem [shape: f32[16,8], index: 10, kind: output, shape index: {4}]   ;;  %s6978_s11 = inlined_call_operand.hbm [shape: f32[16,32], index: 11, kind: output, shape index: {5}]   ;;  %s6979_s12 = inlined_call_operand.hbm [shape: f32[16,32], index: 12, kind: output, shape index: {6}]   ;;  %s6980_s13 = inlined_call_operand.hbm [shape: f32[16,32], index: 13, kind: output, shape index: {7}]  }
   0x1   :  { %7001 = sst [smem:[#allocation23_spill]] %s6967_s0 }
   0x2   :  { %7002 = sst [smem:[#allocation24_spill]] %s6968_s1 }
   0x3   :  { %7003 = sst [smem:[#allocation25_spill]] %s6978_s11 }
   0x4   :  { %7004 = sst [smem:[#allocation26_spill]] %s6979_s12 }
   0x5   :  { %7005 = sst [smem:[#allocation27_spill]] %s6980_s13 }
   0x6   :  { %19 = vsyncpa [#allocation3], 0 }
   0x7   :  { %21 = vsyncpa [#allocation3 + $0x1], 0 }
   0x8   :  { %22 = vsyncpa [#allocation6], 0 }
   0x9   :  { %24 = vsyncpa [#allocation6 + $0x1], 0 }
   0xa   :  { %25 = vsyncpa [#allocation4], 0 }
   0xb   :  { %27 = vsyncpa [#allocation4 + $0x1], 0 }
   0xc   :  { %28 = vsyncpa [#allocation10], 0 }
   0xd   :  { %30 = vsyncpa [#allocation10 + $0x1], 0  ;;  %s5888_s25 = smov 0   ;;  %s5890_s26 = smov 0  }
   0xe   :  { %s5892_s27 = smov 0   ;;  %s5894_s28 = smov 0  }
   0xf LB: > { %7006 = sst [smem:[#allocation16_spill]] %s5793_s25  ;;  %s5909_s29 = sadd.s32 4294967295, %s5805_s28   ;;  %s5805_s28 = sphi %s5894_s28, %s7038_s28   ;;  %s5801_s27 = sphi %s5892_s27, %s7040_s27   ;;  %s5797_s26 = sphi %s5890_s26, %s7042_s26   ;;  %s5793_s25 = sphi %s5888_s25, %s7041_s25  }
  0x10   : > { %7007 = sst [smem:[#allocation17_spill]] %s5801_s27  ;;  %s6981_s30 = sadd.s32 4294967294, %s5805_s28  }
  0x11   : > { %7008 = sst [smem:[#allocation18_spill]] %s5805_s28  ;;  %s5913_s14 = sadd.s32 1, %s5805_s28  }
  0x12   : > { %7009 = sst [smem:[#allocation19_spill]] %s5913_s14  ;;  %s43_s15 = sadd.s32 1, %s5801_s27 }
  0x13   : > { %s40_s16 = ssub.s32 %s5805_s28, %s5913_s14  ;;  %p50_p0 = scmp.ne.s32.totalorder %s5801_s27, %s5797_s26 }
  0x14   : > { %p41_p1 = scmp.eq.s32.totalorder %s40_s16, 0  ;;  %p51_p2 = scmp.eq.s32.totalorder %s5805_s28, 0 }
  0x15   : > { %p56_p3 = scmp.ne.s32.totalorder %s5797_s26, %s5793_s25  ;;  %p57_p4 = scmp.eq.s32.totalorder %s5909_s29, 0 }
  0x16   : > { %s5925_s17 = scalar_select %p41_p1, %s5801_s27, %s43_s15  }
  0x17   : > { %p52_p5 = por %p51_p2, %p50_p0  ;;  %p5927_p6 = por %p57_p4, %p56_p3 }
  0x18   : > { %7010 = sst [smem:[#allocation20_spill]] %s5925_s17  ;;  %p340_p7 = scmp.eq.s32.totalorder %s5909_s29, 1 }
  0x19   : > { %s7011_s18 = scalar_select %p5927_p6, 1, 0 }
  0x1a   : > { %p346_p8 = scmp.eq.s32.totalorder %s6981_s30, 1  ;;  %p5448_p10 = scmp.lt.s32.totalorder %s5805_s28, 2 }
  0x1b   : > { %p5936_p11 = por %p340_p7, %p50_p0  ;;  %s6985_s21 = sand.u32 1, %s5801_s27  }
  0x1c   : > { %p5940_p12 = por %p346_p8, %p56_p3  ;;  %s5946_s22 = sshll.u32 %s5805_s28, 10 }
  0x1d   : > { %s7012_s19 = scalar_select %p5936_p11, 1, 0 }
  0x1e   : > { %s7014_s20 = scalar_select %p5940_p12, 1, 0 }
  0x1f   : > { %7013 = sst [smem:[#allocation21_spill]] %s7012_s19  ;;  %s5950_s23 = sshll.u32 %s6985_s21, 6 }
  0x20   : > { %7015 = sst [smem:[#allocation22_spill]] %s7014_s20  ;;  %p5952_p13 = pnand %p5448_p10, %p52_p5 }
  0x21   : > { %s439_s15 = sand.u32 1, %s5805_s28   ;;  %s7017_s1 = sld [smem:[#allocation24_spill]] }
  0x22   : > { %s443_s14 = scalar_lea.vmem [#allocation5], %s5950_s23  ;;  %s5967_s21 = scalar_lea.sflag [#allocation6], %s439_s15 }
  0x23   : > { %s450_s20 = sshll.u32 %s443_s14, 4  ;;  %p5973_p2 = pneg %p5952_p13  ;;  %s5964_s20 = int_to_ptr.vmem [resolvable:$true] %s450_s20 }
  0x27   : > { %s5961_s17 = scalar_lea.hbm %s7017_s1, %s5946_s22  ;;  %s5602_s14 = scalar_lea.hbm %s7017_s1, 2048 }
  0x28   : > { %s5597_s25 = scalar_lea.hbm %s5961_s17, 1024  ;;  %p5603_p5 = scmp.lt.s32.totalorder %s5961_s17, %s7017_s1 }
  0x29   : > { %p5598_p1 = scmp.ne.s32.totalorder %s5961_s17, %s5597_s25  ;;  %p5604_p7 = scmp.lt.s32.totalorder %s5602_s14, %s5597_s25 }
  0x2b   : > { %p5600_p3 = pnand %p5973_p2, %p5598_p1  ;;  %p5605_p8 = por %p5604_p7, %p5603_p5 }
  0x2d   : > { %p5601_p4 = pneg %p5600_p3 }
  0x2f   : > { %p5606_p10 = pnand %p5605_p8, %p5601_p4 }
  0x31   : > { %5609 = shalt.err (!%p5606_p10)
}
  0x32   : > { %s5610_s15 = scalar_lea.vmem %s5964_s20, 1024  ;;  %s5807_s19 = smov [#allocation5]  }
  0x33   : > { %p5611_p9 = scmp.ne.s32.totalorder %s5964_s20, %s5610_s15  ;;  %s5615_s30 = sshll.u32 %s5807_s19, 4  ;;  %s5616_s30 = int_to_ptr.vmem [resolvable:$false] %s5615_s30 }
  0x34   : > { %s5617_s16 = scalar_lea.vmem %s5616_s30, 2048  ;;  %p5618_p0 = scmp.lt.s32.totalorder %s5964_s20, %s5616_s30 }
  0x35   : > { %p5613_p1 = pnand %p5611_p9, %p5973_p2  ;;  %p5619_p12 = scmp.lt.s32.totalorder %s5617_s16, %s5610_s15 }
  0x37   : > { %p5614_p3 = pneg %p5613_p1  ;;  %p5620_p11 = por %p5619_p12, %p5618_p0 }
  0x39   : > { %p5621_p6 = pnand %p5620_p11, %p5614_p3 }
  0x3b   : > { %5624 = shalt.err (!%p5621_p6)
}
  0x3c   : > { %s6994_s11 = smov 128   ;;  %s6996_s12 = smov 8  }
  0x3d   : > { %5434 = dma.hbm_to_vmem [thread:$0]  (!%p5952_p13), %s5961_s17, 1024, %s5964_s20, %s5967_s21, %s6994_s11, %s6994_s11, %s6996_s12  }
  0x3e   : > { %p500_p9 = scmp.lt.s32.totalorder %s5805_s28, 3  ;;  %s7019_s0 = sld [smem:[#allocation23_spill]] }
  0x3f   : > { %p7020_p6 = scmp.ge.s32.totalorder %s5805_s28, 1  ;;  %s422_s30 = scalar_lea.vmem [#allocation2], %s5950_s23 }
  0x40   : > { %s429_s16 = sshll.u32 %s422_s30, 4  ;;  %s7022_s1 = sand.u32 1, %s5801_s27   ;;  %s6013_s16 = int_to_ptr.vmem [resolvable:$true] %s429_s16 }
  0x41   : > { %p6008_p11 = pnand %p7020_p6, %p500_p9  ;;  %s419_s17 = scalar_lea.sflag [#allocation3], %s7022_s1 }
  0x43   : > { %s7021_s15 = scalar_select %p6008_p11, 1, 0 }
  0x44   : > { %s6004_s14 = scalar_lea.hbm %s7019_s0, %s5946_s22  ;;  %s5630_s11 = scalar_lea.hbm %s7019_s0, 2048 }
  0x45   : > { %s5625_s20 = scalar_lea.hbm %s6004_s14, 1024  ;;  %p5631_p5 = scmp.lt.s32.totalorder %s6004_s14, %s7019_s0 }
  0x46   : > { %p5626_p12 = scmp.ne.s32.totalorder %s6004_s14, %s5625_s20  ;;  %p5632_p7 = scmp.lt.s32.totalorder %s5630_s11, %s5625_s20 }
  0x48   : > { %p5628_p0 = pnand %p5626_p12, %p5973_p2  ;;  %p5633_p8 = por %p5632_p7, %p5631_p5 }
  0x4a   : > { %p5629_p4 = pneg %p5628_p0 }
  0x4c   : > { %p5634_p10 = pnand %p5633_p8, %p5629_p4 }
  0x4e   : > { %5637 = shalt.err (!%p5634_p10)
}
  0x4f   : > { %s5638_s1 = scalar_lea.vmem %s6013_s16, 1024  ;;  %s5810_s30 = smov [#allocation2]  }
  0x50   : > { %p5639_p1 = scmp.ne.s32.totalorder %s6013_s16, %s5638_s1  ;;  %s5643_s25 = sshll.u32 %s5810_s30, 4  ;;  %s5644_s25 = int_to_ptr.vmem [resolvable:$false] %s5643_s25 }
  0x51   : > { %s5645_s19 = scalar_lea.vmem %s5644_s25, 2048  ;;  %p5646_p6 = scmp.lt.s32.totalorder %s6013_s16, %s5644_s25 }
  0x52   : > { %p5641_p3 = pnand %p5639_p1, %p5973_p2  ;;  %p5647_p12 = scmp.lt.s32.totalorder %s5645_s19, %s5638_s1 }
  0x54   : > { %p5642_p9 = pneg %p5641_p3  ;;  %p5648_p0 = por %p5647_p12, %p5646_p6 }
  0x56   : > { %p5649_p11 = pnand %p5648_p0, %p5642_p9 }
  0x58   : > { %5652 = shalt.err (!%p5649_p11)
}
  0x59   : > { %s7023_s28 = smov 8   ;;  %s7024_s11 = smov 128  }
  0x5a   : > { %5431 = dma.hbm_to_vmem [thread:$0]  (!%p5952_p13), %s6004_s14, 1024, %s6013_s16, %s419_s17, %s7024_s11, %s7024_s11, %s7023_s28  }
  0x5b   : > { %s6044_s30 = scalar_lea.hbm %s6969_s2, %s5946_s22  ;;  %s464_s1 = scalar_lea.vmem [#allocation7], %s5950_s23 }
  0x5c   : > { %s471_s25 = sshll.u32 %s464_s1, 4  ;;  %s5653_s19 = scalar_lea.hbm %s6044_s30, 1024  ;;  %s472_s25 = int_to_ptr.vmem [resolvable:$true] %s471_s25 }
  0x5d   : > { %p5654_p11 = scmp.ne.s32.totalorder %s6044_s30, %s5653_s19  ;;  %s5658_s14 = scalar_lea.hbm %s6969_s2, 2048 }
  0x5e   : > { %p5659_p7 = scmp.lt.s32.totalorder %s6044_s30, %s6969_s2  ;;  %p5660_p8 = scmp.lt.s32.totalorder %s5658_s14, %s5653_s19 }
  0x5f   : > { %p5656_p4 = pnand %p5654_p11, %p5973_p2 }
  0x60   : > { %p5661_p10 = por %p5660_p8, %p5659_p7 }
  0x61   : > { %p5657_p5 = pneg %p5656_p4 }
  0x63   : > { %p5662_p1 = pnand %p5661_p10, %p5657_p5 }
  0x65   : > { %5665 = shalt.err (!%p5662_p1)
}
  0x66   : > { %s5666_s22 = scalar_lea.vmem %s472_s25, 1024  ;;  %s5811_s23 = smov [#allocation7]  }
  0x67   : > { %p5667_p3 = scmp.ne.s32.totalorder %s472_s25, %s5666_s22  ;;  %s5671_s12 = sshll.u32 %s5811_s23, 4  ;;  %s5672_s12 = int_to_ptr.vmem [resolvable:$false] %s5671_s12 }
  0x68   : > { %s5673_s20 = scalar_lea.vmem %s5672_s12, 2048  ;;  %p5674_p12 = scmp.lt.s32.totalorder %s472_s25, %s5672_s12 }
  0x69   : > { %p5669_p9 = pnand %p5667_p3, %p5973_p2  ;;  %p5675_p0 = scmp.lt.s32.totalorder %s5673_s20, %s5666_s22 }
  0x6b   : > { %p5670_p6 = pneg %p5669_p9  ;;  %p5676_p11 = por %p5675_p0, %p5674_p12 }
  0x6d   : > { %p5677_p4 = pnand %p5676_p11, %p5670_p6 }
  0x6f   : > { %5680 = shalt.err (!%p5677_p4)
}
  0x70   : > { %5437 = dma.hbm_to_vmem [thread:$0]  (!%p5952_p13), %s6044_s30, 1024, %s472_s25, %s5967_s21, %s7024_s11, %s7024_s11, %s7023_s28  }
  0x71   : > { %p7025_p2 = scmp.ne.s32.totalorder %s7021_s15, 0 }
  0x72   : > { %s6070_s0 = sand.u32 (!%p7025_p2), 1, %s5797_s26   ;;  %p7026_p5 = scmp.ne.s32.totalorder (!%p7025_p2), %s7011_s18, 0 }
  0x73   : > { %504 = sbr.rel (%p7025_p2) target bundleno = 1525 (0x5f5), region = 44  ;;  %s6073_s13 = sshll.u32 (!%p7025_p2), %s6070_s0, 6 }
  0x74   : > { %s507_s27 = scalar_lea.sflag (!%p7025_p2), [#allocation3], %s6070_s0  ;;  %s6077_s24 = scalar_lea.vmem (!%p7025_p2), [#allocation2], %s6073_s13 }
  0x78   : > { %5776 = dma.done.wait (%p7026_p5), %s507_s27, 1024  }
  0x79   : > { %5778 = vsyncadd (%p7026_p5), %s507_s27, 4294966272  ;;  %s515_s21 = sand.u32 1, %s5909_s29   ;;  %s6087_s28 = scalar_lea.vmem [#allocation5], %s6073_s13 }
  0x7a   : > { %s516_s15 = scalar_lea.sflag [#allocation6], %s515_s21 }
  0x7b   : > { %5780 = dma.done.wait (%p7026_p5), %s516_s15, 2048  }
  0x7c   : > { %5782 = vsyncadd (%p7026_p5), %s516_s15, 4294965248  ;;  %v5812_v0 = vmov 0.0   ;;  %p628_p13 = scmp.lt.s32.totalorder %s5909_s29, 1  ;;  %vm5813_vm0 = vmmov 0   ;;  %vm688_vm1 = vcmask 261120   ;;  %v1948_v1 = vlaneseq  ;;  %v672_v2 = vld [vmem:[%s6087_s28] sm:$0xff] }
  0x7d   : > { %5216 = vmatprep.subr.mxu0 %v5812_v0  ;;  %5221 = vmatprep.subr.mxu1 %v5812_v0  ;;  %v673_v3 = vld [vmem:[%s6087_s28 + $0x8] sm:$0xff]  ;;  %v6106_v4 = vld [vmem:[%s6077_s24] sm:$0xff]  ;;  %v674_v6 = vld [vmem:[%s6087_s28 + $0x10] sm:$0xff]  ;;  %s5062_s19 = sshll.u32 %s5909_s29, 3  ;;  %vm1897_vm2 = vcmask 64512   ;;  %s6292_s23 = scalar_lea.vmem [#allocation7], %s6073_s13 }
  0x7e   : > { %5218 = vmatprep.mubr.msk.f32.mxu0 %vm5813_vm0, %v5812_v0  ;;  %5223 = vmatprep.mubr.msk.f32.mxu1 %vm5813_vm0, %v5812_v0  ;;  %s629_s18 = scalar_select %p628_p13, %s5909_s29, 1  ;;  %v6109_v5 = vld [vmem:[%s6077_s24 + $0x8] sm:$0xff]  ;;  %v675_v7 = vld [vmem:[%s6087_s28 + $0x18] sm:$0xff]  ;;  %v6118_v8 = vshrl.u32 %v1948_v1, 7  ;;  %v6127_v9 = vld [vmem:[%s6077_s24 + $0x10] sm:$0xff]  ;;  %vm2086_vm3 = vcmask 1041409  }
  0x7f   : > { %5217 = vmatpush3.xpose.msk.msra.mxu0 %vm688_vm1, %v672_v2  ;;  %5222 = vmatpush3.xpose.msk.msra.mxu1 %vm688_vm1, %v673_v3  ;;  %v6130_v10 = vld [vmem:[%s6077_s24 + $0x18] sm:$0xff]  ;;  %v676_v11 = vld [vmem:[%s6087_s28 + $0x20] sm:$0xff]  ;;  %v677_v12 = vld [vmem:[%s6087_s28 + $0x28] sm:$0xff]  ;;  %p641_p7 = scmp.lt.s32.totalorder %s5062_s19, 15  ;;  %v5814_v2 = vmov 0   ;;  %vm2088_vm4 = vcmask 1042434  }
  0x80   : > { %5226 = vmatprep.subr.mxu0 %v5812_v0  ;;  %5231 = vmatprep.subr.mxu1 %v5812_v0  ;;  %s6115_s11 = sshll.u32 %s629_s18, 3  ;;  %v6145_v13 = vsub.s32 1, %v6118_v8  ;;  %v6148_v14 = vsub.s32 0, %v6118_v8  ;;  %v6159_v16 = vld [vmem:[%s6077_s24 + $0x20] sm:$0xff]  ;;  %v6162_v17 = vld [vmem:[%s6077_s24 + $0x28] sm:$0xff]  ;;  %v678_v18 = vld [vmem:[%s6087_s28 + $0x30] sm:$0xff] }
  0x81   : > { %s631_s25 = scalar_lea.vmem %s6970_s3, %s6115_s11  ;;  %v679_v19 = vld [vmem:[%s6087_s28 + $0x38] sm:$0xff]  ;;  %v6175_v21 = vsub.s32 2, %v6118_v8  ;;  %v6180_v23 = vsub.s32 4, %v6118_v8  ;;  %v6189_v24 = vld [vmem:[%s6077_s24 + $0x30] sm:$0xff]  ;;  %v6201_v27 = vsub.s32 3, %v6118_v8  ;;  %v6218_v30 = vsub.s32 5, %v6118_v8  ;;  %5487 = vset.pattern.permute.xlu0 %v5814_v2  ;;  %5488 = vset.pattern.permute.xlu1 %v5814_v2  ;;  %s639_s18 = scalar_lea.vmem %s6972_s5, %s6115_s11 }
  0x82   : > { %5219 = vmatmul.mubr.msk.f32.vlgmr.msra.gmra.mxu0 %vm688_vm1, %v6106_v4  ;;  %5224 = vmatmul.mubr.msk.f32.vlgmr.msra.gmra.mxu1 %vm688_vm1, %v6109_v5  ;;  %v6154_v15 = vld [vmem:[%s631_s25] sm:$0xff]  ;;  %v6192_v25 = vld [vmem:[%s6077_s24 + $0x38] sm:$0xff]  ;;  %s7044_s19 = smov (!%p641_p7, %s5062_s19), 15  ;;  %v6282_v3 = vsub.s32 7, %v6118_v8  ;;  %vm2090_vm5 = vcmask 1043459   ;;  %vm2092_vm6 = vcmask 1044484   ;;  %s635_s25 = scalar_lea.vmem %s6971_s4, %s6115_s11 }
  0x83   : > { %5227 = vmatpush3.xpose.msk.msra.mxu0 %vm688_vm1, %v674_v6  ;;  %5232 = vmatpush3.xpose.msk.msra.mxu1 %vm688_vm1, %v675_v7  ;;  %v1958_v20 = vrot.slane %v6154_v15, %v6145_v13  ;;  %v1951_v22 = vrot.slane %v6154_v15, %v6148_v14  ;;  %v1965_v26 = vrot.slane %v6154_v15, %v6175_v21  ;;  %s5063_s14 = sshll.u32 %s7044_s19, 3  ;;  %v6285_v6 = vsub.s32 6, %v6118_v8  ;;  %s659_s16 = scalar_lea.vmem %s6976_s9, %s6115_s11 }
  0x84   : > { %5228 = vmatprep.mubr.msk.f32.mxu0 %vm5813_vm0, %v5812_v0  ;;  %5233 = vmatprep.mubr.msk.f32.mxu1 %vm5813_vm0, %v5812_v0  ;;  %v1979_v28 = vrot.slane %v6154_v15, %v6180_v23  ;;  %v1972_v29 = vrot.slane %v6154_v15, %v6201_v27  ;;  %v1986_v31 = vrot.slane %v6154_v15, %v6218_v30  ;;  %s6231_s22 = scalar_lea.vmem %s6973_s6, %s5063_s14  ;;  %s650_s13 = scalar_lea.vmem %s6974_s7, %s5063_s14  ;;  %vm2094_vm7 = vcmask 1045509  }
  0x85   : > { %5236 = vmatprep.subr.mxu0 %v5812_v0  ;;  %5241 = vmatprep.subr.mxu1 %v5812_v0  ;;  %v2000_v7 = vrot.slane %v6154_v15, %v6282_v3  ;;  %vm2096_vm8 = vcmask 1046534   ;;  %vm2098_vm9 = vcmask 1047559   ;;  %s655_s12 = scalar_lea.vmem %s6975_s8, %s6115_s11  ;;  %s663_s20 = scalar_lea.vmem %s6977_s10, %s6115_s11 }
  0x86   : > { %5229 = vmatmul.mubr.msk.f32.vlgmr.msra.gmra.mxu0 %vm688_vm1, %v6127_v9  ;;  %5234 = vmatmul.mubr.msk.f32.vlgmr.msra.gmra.mxu1 %vm688_vm1, %v6130_v10  ;;  %s6843_s11 = sshll.u32 %s6070_s0, 3  ;;  %s7027_s15 = sld [smem:[#allocation21_spill]] }
  0x87   : > { %5237 = vmatpush3.xpose.msk.msra.mxu0 %vm688_vm1, %v676_v11  ;;  %5242 = vmatpush3.xpose.msk.msra.mxu1 %vm688_vm1, %v677_v12  ;;  %v1993_v11 = vrot.slane %v6154_v15, %v6285_v6  ;;  %v680_v12 = vld [vmem:[%s6292_s23] sm:$0xff]  ;;  %v683_v15 = vld [vmem:[%s6292_s23 + $0x18] sm:$0xff]  ;;  %s7028_s1 = sld [smem:[#allocation25_spill]]  ;;  %s4642_s19 = scalar_lea.sflag [#allocation4], %s6070_s0 }
  0x88   : > { %5238 = vmatprep.mubr.msk.f32.mxu0 %vm5813_vm0, %v5812_v0  ;;  %5243 = vmatprep.mubr.msk.f32.mxu1 %vm5813_vm0, %v5812_v0 }
  0x89   : > { %5246 = vmatprep.subr.mxu0 %v5812_v0  ;;  %5251 = vmatprep.subr.mxu1 %v5812_v0 }
  0x8a   : > { %5239 = vmatmul.mubr.msk.f32.vlgmr.msra.gmra.mxu0 %vm688_vm1, %v6159_v16  ;;  %5244 = vmatmul.mubr.msk.f32.vlgmr.msra.gmra.mxu1 %vm688_vm1, %v6162_v17 }
  0x8b   : > { %5247 = vmatpush3.xpose.msk.msra.mxu0 %vm688_vm1, %v678_v18  ;;  %5252 = vmatpush3.xpose.msk.msra.mxu1 %vm688_vm1, %v679_v19  ;;  %v681_v18 = vld [vmem:[%s6292_s23 + $0x8] sm:$0xff]  ;;  %v682_v19 = vld [vmem:[%s6292_s23 + $0x10] sm:$0xff] }
  0x8c   : > { %5248 = vmatprep.mubr.msk.f32.mxu0 %vm5813_vm0, %v5812_v0  ;;  %5253 = vmatprep.mubr.msk.f32.mxu1 %vm5813_vm0, %v5812_v0  ;;  %p7029_p10 = scmp.ne.s32.totalorder %s7027_s15, 0 }
  0x8d   : > { %1960 = vbcast.lane.b32.xlu1 %v1958_v20, 256  ;;  %1953 = vbcast.lane.b32.xlu0 %v1951_v22, 256  ;;  %v684_v20 = vld [vmem:[%s6292_s23 + $0x20] sm:$0xff]  ;;  %v685_v22 = vld [vmem:[%s6292_s23 + $0x28] sm:$0xff] }
  0x8e   : > { %5249 = vmatmul.mubr.msk.f32.vlgmr.msra.gmra.mxu0 %vm688_vm1, %v6189_v24  ;;  %5254 = vmatmul.mubr.msk.f32.vlgmr.msra.gmra.mxu1 %vm688_vm1, %v6192_v25 }
  0x8f   : > { %5256 = vmatprep.subr.mxu0 %v5812_v0  ;;  %5261 = vmatprep.subr.mxu1 %v5812_v0 }
  0x90   : > { %5258 = vmatprep.mubr.msk.f32.mxu0 %vm5813_vm0, %v5812_v0  ;;  %5263 = vmatprep.mubr.msk.f32.mxu1 %vm5813_vm0, %v5812_v0 }
  0x91   : > { %1967 = vbcast.lane.b32.xlu1 %v1965_v26, 256  ;;  %1981 = vbcast.lane.b32.xlu0 %v1979_v28, 256  ;;  %v686_v26 = vld [vmem:[%s6292_s23 + $0x30] sm:$0xff]  ;;  %v687_v28 = vld [vmem:[%s6292_s23 + $0x38] sm:$0xff] }
  0x92   : > { %5257 = vmatpush3.xpose.msk.msra.mxu0 %vm688_vm1, %v680_v12  ;;  %5262 = vmatpush3.xpose.msk.msra.mxu1 %vm688_vm1, %v681_v18 }
  0x93   : > { %5266 = vmatprep.subr.mxu0 %v5812_v0  ;;  %5271 = vmatprep.subr.mxu1 %v5812_v0 }
  0x95   : > { %1974 = vbcast.lane.b32.xlu1 %v1972_v29, 256  ;;  %5259 = vmatmul.mubr.msk.f32.vlgmr.msra.gmra.mxu0 %vm688_vm1, %v6106_v4 }
  0x96   : > { %5264 = vmatmul.mubr.msk.f32.vlgmr.msra.gmra.mxu1 %vm688_vm1, %v6109_v5  ;;  %5267 = vmatpush3.xpose.msk.msra.mxu0 %vm688_vm1, %v682_v19 }
  0x97   : > { %5272 = vmatpush3.xpose.msk.msra.mxu1 %vm688_vm1, %v683_v15  ;;  %5268 = vmatprep.mubr.msk.f32.mxu0 %vm5813_vm0, %v5812_v0 }
  0x98   : > { %5273 = vmatprep.mubr.msk.f32.mxu1 %vm5813_vm0, %v5812_v0  ;;  %5276 = vmatprep.subr.mxu0 %v5812_v0 }
  0x99   : > { %1988 = vbcast.lane.b32.xlu1 %v1986_v31, 256  ;;  %5269 = vmatmul.mubr.msk.f32.vlgmr.msra.gmra.mxu0 %vm688_vm1, %v6127_v9 }
  0x9a   : > { %5281 = vmatprep.subr.mxu1 %v5812_v0  ;;  %5274 = vmatmul.mubr.msk.f32.vlgmr.msra.gmra.mxu1 %vm688_vm1, %v6130_v10 }
  0x9b   : > { %5277 = vmatpush3.xpose.msk.msra.mxu0 %vm688_vm1, %v684_v20  ;;  %5282 = vmatpush3.xpose.msk.msra.mxu1 %vm688_vm1, %v685_v22 }
  0x9c   : > { %5278 = vmatprep.mubr.msk.f32.mxu0 %vm5813_vm0, %v5812_v0  ;;  %5283 = vmatprep.mubr.msk.f32.mxu1 %vm5813_vm0, %v5812_v0 }
  0x9d   : > { %5286 = vmatprep.subr.mxu0 %v5812_v0  ;;  %5291 = vmatprep.subr.mxu1 %v5812_v0 }
  0x9e   : > { %5279 = vmatmul.mubr.msk.f32.vlgmr.msra.gmra.mxu0 %vm688_vm1, %v6159_v16  ;;  %5284 = vmatmul.mubr.msk.f32.vlgmr.msra.gmra.mxu1 %vm688_vm1, %v6162_v17 }
  0x9f   : > { %5287 = vmatpush3.xpose.msk.msra.mxu0 %vm688_vm1, %v686_v26  ;;  %5292 = vmatpush3.xpose.msk.msra.mxu1 %vm688_vm1, %v687_v28 }
  0xa0   : > { %5288 = vmatprep.mubr.msk.f32.mxu0 %vm5813_vm0, %v5812_v0  ;;  %5293 = vmatprep.mubr.msk.f32.mxu1 %vm5813_vm0, %v5812_v0 }
  0xa1   : > { %5296 = vmatprep.subr.mxu0 %v5812_v0  ;;  %5301 = vmatprep.subr.mxu1 %v5812_v0 }
  0xa2   : > { %5289 = vmatmul.mubr.msk.f32.vlgmr.msra.gmra.mxu0 %vm688_vm1, %v6189_v24  ;;  %5294 = vmatmul.mubr.msk.f32.vlgmr.msra.gmra.mxu1 %vm688_vm1, %v6192_v25 }
  0xa3   : > { %5297 = vmatpush3.msra.mxu0 %v6106_v4  ;;  %5298 = vmatprep.mubr.msk.f32.mxu0 %vm5813_vm0, %v5812_v0 }
  0xa4   : > { %5302 = vmatpush3.msra.mxu1 %v6109_v5  ;;  %5303 = vmatprep.mubr.msk.f32.mxu1 %vm5813_vm0, %v5812_v0 }
  0xa5   : > { %5306 = vmatprep.subr.mxu0 %v5812_v0  ;;  %5311 = vmatprep.subr.mxu1 %v5812_v0 }
  0xff   : > { %v1961_v9 = vpop.permute.xlu1 %1960  ;;  %v1954_v16 = vpop.permute.xlu0 %1953 }
 0x103   : > { %v1968_v10 = vpop.permute.xlu1 %1967  ;;  %v1982_v24 = vpop.permute.xlu0 %1981 }
 0x107   : > { %v1975_v17 = vpop.permute.xlu1 %1974 }
 0x10b   : > { %v1989_v25 = vpop.permute.xlu1 %1988 }
 0x142   : > { %v761_v32 = vpop.f32.mrf.mxu0  ;;  %v837_v33 = vpop.f32.mrf.mxu1 }
 0x143   : > { %5489 = vtanh.f32 %v761_v32 }
 0x144   : > { %5491 = vtanh.f32 %v837_v33  ;;  %v5220_v34 = vpop.f32.mrf.mxu0  ;;  %v5225_v35 = vpop.f32.mrf.mxu1 }
 0x146   : > { %v913_v36 = vpop.f32.mrf.mxu0  ;;  %v989_v37 = vpop.f32.mrf.mxu1 }
 0x147   : > { %5493 = vtanh.f32 %v913_v36 }
 0x148   : > { %5495 = vtanh.f32 %v989_v37  ;;  %v5230_v38 = vpop.f32.mrf.mxu0  ;;  %v5235_v39 = vpop.f32.mrf.mxu1 }
 0x14a   : > { %v1065_v40 = vpop.f32.mrf.mxu0  ;;  %v1141_v41 = vpop.f32.mrf.mxu1 }
 0x14b   : > { %5497 = vtanh.f32 %v1065_v40 }
 0x14c   : > { %5499 = vtanh.f32 %v1141_v41  ;;  %v5240_v42 = vpop.f32.mrf.mxu0  ;;  %v5245_v43 = vpop.f32.mrf.mxu1 }
 0x14e   : > { %v1217_v44 = vpop.f32.mrf.mxu0  ;;  %v1293_v45 = vpop.f32.mrf.mxu1 }
 0x14f   : > { %5501 = vtanh.f32 %v1217_v44 }
 0x150   : > { %v5490_v46 = vpop.eup %5489  ;;  %5503 = vtanh.f32 %v1293_v45  ;;  %v5250_v47 = vpop.f32.mrf.mxu0 }
 0x151   : > { %v5255_v48 = vpop.f32.mrf.mxu1  ;;  %v5492_v49 = vpop.eup %5491  ;;  %1898 = vst.msk [vmem:[%s6231_s22] sm:$0xff] %vm1897_vm2, %v5490_v46  ;;  %v6236_v50 = vsel %vm1897_vm2, %v5490_v46, 0.0 }
 0x152   : > { %1899 = vst.msk [vmem:[%s6231_s22 + $0x8] sm:$0xff] %vm1897_vm2, %v5492_v49  ;;  %1915 = vadd.xlane.f32.xlu0 %v6236_v50  ;;  %v6244_v53 = vsel %vm1897_vm2, %v5492_v49, 0.0 }
 0x154   : > { %v5494_v51 = vpop.eup %5493 }
 0x155   : > { %v5496_v52 = vpop.eup %5495  ;;  %1900 = vst.msk [vmem:[%s6231_s22 + $0x10] sm:$0xff] %vm1897_vm2, %v5494_v51  ;;  %v6247_v54 = vsel %vm1897_vm2, %v5494_v51, 0.0 }
 0x156   : > { %1901 = vst.msk [vmem:[%s6231_s22 + $0x18] sm:$0xff] %vm1897_vm2, %v5496_v52  ;;  %1918 = vadd.xlane.f32.xlu0 %v6244_v53  ;;  %1921 = vadd.xlane.f32.xlu1 %v6247_v54  ;;  %v6256_v57 = vsel %vm1897_vm2, %v5496_v52, 0.0 }
 0x158   : > { %v5498_v55 = vpop.eup %5497 }
 0x159   : > { %v5500_v56 = vpop.eup %5499  ;;  %1902 = vst.msk [vmem:[%s6231_s22 + $0x20] sm:$0xff] %vm1897_vm2, %v5498_v55  ;;  %v6259_v58 = vsel %vm1897_vm2, %v5498_v55, 0.0 }
 0x15a   : > { %1903 = vst.msk [vmem:[%s6231_s22 + $0x28] sm:$0xff] %vm1897_vm2, %v5500_v56  ;;  %1924 = vadd.xlane.f32.xlu1 %v6256_v57  ;;  %1927 = vadd.xlane.f32.xlu0 %v6259_v58  ;;  %v6268_v61 = vsel %vm1897_vm2, %v5500_v56, 0.0 }
 0x15c   : > { %v5502_v59 = vpop.eup %5501 }
 0x15d   : > { %v5504_v60 = vpop.eup %5503  ;;  %1904 = vst.msk [vmem:[%s6231_s22 + $0x30] sm:$0xff] %vm1897_vm2, %v5502_v59  ;;  %v6271_v62 = vsel %vm1897_vm2, %v5502_v59, 0.0  ;;  %v1374_v59 = vpop.f32.mrf.mxu0 }
 0x15e   : > { %1905 = vst.msk [vmem:[%s6231_s22 + $0x38] sm:$0xff] %vm1897_vm2, %v5504_v60  ;;  %1930 = vadd.xlane.f32.xlu1 %v6268_v61  ;;  %1933 = vadd.xlane.f32.xlu0 %v6271_v62  ;;  %v6278_v63 = vsel %vm1897_vm2, %v5504_v60, 0.0  ;;  %5505 = vtanh.f32 %v1374_v59  ;;  %v1447_v60 = vpop.f32.mrf.mxu1 }
 0x15f   : > { %5507 = vtanh.f32 %v1447_v60  ;;  %v5260_v2 = vpop.f32.mrf.mxu0 }
 0x162   : > { %1936 = vadd.xlane.f32.xlu1 %v6278_v63 }
 0x173   : > { %2002 = vbcast.lane.b32.xlu1 %v2000_v7, 256  ;;  %v5265_v7 = vpop.f32.mrf.mxu1 }
 0x174   : > { %1995 = vbcast.lane.b32.xlu0 %v1993_v11, 256  ;;  %v1520_v11 = vpop.f32.mrf.mxu0 }
 0x175   : > { %5509 = vtanh.f32 %v1520_v11  ;;  %v1593_v12 = vpop.f32.mrf.mxu1 }
 0x176   : > { %5511 = vtanh.f32 %v1593_v12  ;;  %v5270_v18 = vpop.f32.mrf.mxu0 }
 0x177   : > { %v5275_v19 = vpop.f32.mrf.mxu1 }
 0x178   : > { %v1666_v15 = vpop.f32.mrf.mxu0 }
 0x179   : > { %5513 = vtanh.f32 %v1666_v15  ;;  %v1739_v20 = vpop.f32.mrf.mxu1 }
 0x17a   : > { %5515 = vtanh.f32 %v1739_v20  ;;  %v5280_v22 = vpop.f32.mrf.mxu0 }
 0x17b   : > { %v5285_v26 = vpop.f32.mrf.mxu1 }
 0x17c   : > { %v1812_v28 = vpop.f32.mrf.mxu0 }
 0x17d   : > { %5517 = vtanh.f32 %v1812_v28 }
 0x1db   : > { %v1916_v29 = vpop.xlane.xlu0 %1915 }
 0x1dc   : > { %v1938_v4 = vmul.f32 0.125, %v1916_v29 }
 0x1de   : > { %v6354_v31 = vadd.f32 %v1954_v16, %v1938_v4  ;;  %v5290_v16 = vpop.f32.mrf.mxu0 }
 0x1df   : > { %v1919_v32 = vpop.xlane.xlu0 %1918  ;;  %v1922_v33 = vpop.xlane.xlu1 %1921 }
 0x1e0   : > { %v1939_v5 = vmul.f32 0.125, %v1919_v32  ;;  %2029 = vperm.xlu0 %5487, %v6354_v31   ;;  %v1940_v35 = vmul.f32 0.125, %v1922_v33 }
 0x1e2   : > { %v6357_v34 = vadd.f32 %v1961_v9, %v1939_v5  ;;  %v6360_v39 = vadd.f32 %v1968_v10, %v1940_v35  ;;  %v1885_v9 = vpop.f32.mrf.mxu1  ;;  %v5506_v10 = vpop.eup %5505  ;;  %v2053_v35 = vand.u32 127, %v1948_v1 }
 0x1e3   : > { %v1925_v36 = vpop.xlane.xlu1 %1924  ;;  %v1928_v37 = vpop.xlane.xlu0 %1927  ;;  %5519 = vtanh.f32 %v1885_v9  ;;  %1906 = vst.msk [vmem:[%s650_s13] sm:$0xff] %vm1897_vm2, %v5506_v10 }
 0x1e4   : > { %v1941_v38 = vmul.f32 0.125, %v1925_v36  ;;  %2032 = vperm.xlu1 %5488, %v6357_v34   ;;  %v1942_v41 = vmul.f32 0.125, %v1928_v37  ;;  %v6393_v36 = vsub.s32 %v2053_v35, %v6118_v8 }
 0x1e6   : > { %v6362_v40 = vadd.f32 %v1975_v17, %v1941_v38  ;;  %v6366_v46 = vadd.f32 %v1982_v24, %v1942_v41  ;;  %v5508_v17 = vpop.eup %5507  ;;  %v5295_v24 = vpop.f32.mrf.mxu1  ;;  %v2589_v41 = vsel %vm1897_vm2, %v5506_v10, 0.0 }
 0x1e7   : > { %v1931_v42 = vpop.xlane.xlu1 %1930  ;;  %v1934_v43 = vpop.xlane.xlu0 %1933  ;;  %1907 = vst.msk [vmem:[%s650_s13 + $0x8] sm:$0xff] %vm1897_vm2, %v5508_v17 }
 0x1e8   : > { %v1943_v44 = vmul.f32 0.125, %v1931_v42  ;;  %2035 = vperm.xlu1 %5488, %v6360_v39   ;;  %2038 = vperm.xlu0 %5487, %v6362_v40   ;;  %v1944_v45 = vmul.f32 0.125, %v1934_v43  ;;  %v2596_v42 = vsel %vm1897_vm2, %v5508_v17, 0.0 }
 0x1ea   : > { %v6368_v47 = vadd.f32 %v1989_v25, %v1943_v44  ;;  %v5510_v25 = vpop.eup %5509 }
 0x1eb   : > { %v1937_v48 = vpop.xlane.xlu1 %1936  ;;  %v1996_v49 = vpop.permute.xlu0 %1995  ;;  %1908 = vst.msk [vmem:[%s650_s13 + $0x10] sm:$0xff] %vm1897_vm2, %v5510_v25  ;;  %v2603_v44 = vsel %vm1897_vm2, %v5510_v25, 0.0 }
 0x1ec   : > { %2041 = vperm.xlu1 %5488, %v6366_v46   ;;  %2044 = vperm.xlu0 %5487, %v6368_v47   ;;  %v6372_v51 = vadd.f32 %v1996_v49, %v1944_v45  ;;  %v1945_v52 = vmul.f32 0.125, %v1937_v48  ;;  %v5512_v29 = vpop.eup %5511  ;;  %v2604_v60 = vrot.slane %v2603_v44, 4 }
 0x1ed   : > { %1909 = vst.msk [vmem:[%s650_s13 + $0x18] sm:$0xff] %vm1897_vm2, %v5512_v29  ;;  %v5514_v4 = vpop.eup %5513  ;;  %v2610_v2 = vsel %vm1897_vm2, %v5512_v29, 0.0 }
 0x1ee   : > { %v5516_v32 = vpop.eup %5515  ;;  %1910 = vst.msk [vmem:[%s650_s13 + $0x20] sm:$0xff] %vm1897_vm2, %v5514_v4  ;;  %v2611_v20 = vrot.slane %v2610_v2, 4  ;;  %v2617_v22 = vsel %vm1897_vm2, %v5514_v4, 0.0  ;;  %v2605_v9 = vadd.f32 %v2604_v60, %v2603_v44 }
 0x1ef   : > { %v2003_v55 = vpop.permute.xlu1 %2002  ;;  %1911 = vst.msk [vmem:[%s650_s13 + $0x28] sm:$0xff] %vm1897_vm2, %v5516_v32  ;;  %v5518_v33 = vpop.eup %5517  ;;  %v2618_v25 = vrot.slane %v2617_v22, 4  ;;  %v2624_v29 = vsel %vm1897_vm2, %v5516_v32, 0.0 }
 0x1f0   : > { %v6374_v56 = vadd.f32 %v2003_v55, %v1945_v52  ;;  %2047 = vperm.xlu1 %5488, %v6372_v51   ;;  %v5520_v5 = vpop.eup %5519  ;;  %1912 = vst.msk [vmem:[%s650_s13 + $0x30] sm:$0xff] %vm1897_vm2, %v5518_v33  ;;  %v2590_v52 = vrot.slane %v2589_v41, 4  ;;  %v2597_v55 = vrot.slane %v2596_v42, 4  ;;  %v2625_v44 = vrot.slane %v2624_v29, 4 }
 0x1f1   : > { %1913 = vst.msk [vmem:[%s650_s13 + $0x38] sm:$0xff] %vm1897_vm2, %v5520_v5  ;;  %v2619_v32 = vadd.f32 %v2618_v25, %v2617_v22  ;;  %v2638_v60 = vsel %vm1897_vm2, %v5520_v5, 0.0  ;;  %s610_s13 = scalar_lea.vmem [#allocation8], %s6843_s11 }
 0x1f2   : > { %2050 = vperm.xlu0 %5487, %v6374_v56   ;;  %v2591_v18 = vadd.f32 %v2590_v52, %v2589_v41  ;;  %v2598_v19 = vadd.f32 %v2597_v55, %v2596_v42  ;;  %v2606_v41 = vrot.slane %v2605_v9, 2  ;;  %s4682_s27 = sshll.u32 %s610_s13, 4  ;;  %s6860_s27 = int_to_ptr.vmem [resolvable:$true] %s4682_s27 }
 0x1f3   : > { %s5681_s14 = scalar_lea.vmem %s6860_s27, 128 }
 0x1f4   : > { %v2592_v17 = vrot.slane %v2591_v18, 2  ;;  %v2599_v24 = vrot.slane %v2598_v19, 2  ;;  %p5682_p8 = scmp.ne.s32.totalorder %s6860_s27, %s5681_s14 }
 0x1f6   : > { %p5683_p1 = pnand %p5682_p8, %p7029_p10 }
 0x1f8   : > { %p5684_p3 = pneg %p5683_p1 }
 0x25b   : > { %v2030_v37 = vpop.permute.xlu0 %2029 }
 0x25c   : > { %v2057_v45 = vrot.slane %v2030_v37, %v6393_v36  ;;  %v2612_v37 = vadd.f32 %v2611_v20, %v2610_v2  ;;  %v2626_v2 = vadd.f32 %v2625_v44, %v2624_v29 }
 0x25e   : > { %v2613_v55 = vrot.slane %v2612_v37, 2  ;;  %v2627_v20 = vrot.slane %v2626_v2, 2 }
 0x25f   : > { %v2033_v38 = vpop.permute.xlu1 %2032 }
 0x260   : > { %v2061_v43 = vrot.slane %v2033_v38, %v6393_v36  ;;  %v2628_v5 = vadd.f32 %v2627_v20, %v2626_v2 }
 0x262   : > { %v2087_v8 = vsel %vm2086_vm3, %v2061_v43, %v2057_v45  ;;  %v2631_v45 = vsel %vm1897_vm2, %v5518_v33, 0.0  ;;  %v2614_v33 = vadd.f32 %v2613_v55, %v2612_v37 }
 0x263   : > { %v2036_v48 = vpop.permute.xlu1 %2035  ;;  %v2039_v49 = vpop.permute.xlu0 %2038 }
 0x264   : > { %v2065_v1 = vrot.slane %v2036_v48, %v6393_v36  ;;  %v2069_v59 = vrot.slane %v2039_v49, %v6393_v36  ;;  %v2593_v48 = vadd.f32 %v2592_v17, %v2591_v18  ;;  %v2600_v49 = vadd.f32 %v2599_v24, %v2598_v19 }
 0x266   : > { %v2089_v7 = vsel %vm2088_vm4, %v2065_v1, %v2087_v8  ;;  %v2607_v8 = vadd.f32 %v2606_v41, %v2605_v9  ;;  %v2629_v41 = vrot.slane %v2628_v5, 1 }
 0x267   : > { %v2042_v11 = vpop.permute.xlu1 %2041  ;;  %v2045_v12 = vpop.permute.xlu0 %2044  ;;  %v2091_v26 = vsel %vm2090_vm5, %v2069_v59, %v2089_v7  ;;  %v2632_v59 = vrot.slane %v2631_v45, 4  ;;  %v2594_v7 = vrot.slane %v2593_v48, 1 }
 0x268   : > { %v2073_v15 = vrot.slane %v2042_v11, %v6393_v36  ;;  %v2077_v28 = vrot.slane %v2045_v12, %v6393_v36  ;;  %v2601_v11 = vrot.slane %v2600_v49, 1  ;;  %v2620_v12 = vrot.slane %v2619_v32, 2 }
 0x269   : > { %v2608_v18 = vrot.slane %v2607_v8, 1  ;;  %v2633_v19 = vadd.f32 %v2632_v59, %v2631_v45  ;;  %v2595_v22 = vadd.f32 %v2594_v7, %v2593_v48 }
 0x26a   : > { %v2093_v10 = vsel %vm2092_vm6, %v2073_v15, %v2091_v26  ;;  %v2639_v15 = vrot.slane %v2638_v60, 4  ;;  %v2602_v26 = vadd.f32 %v2601_v11, %v2600_v49 }
 0x26b   : > { %v2048_v16 = vpop.permute.xlu1 %2047  ;;  %v2095_v4 = vsel %vm2094_vm7, %v2077_v28, %v2093_v10  ;;  %v2621_v28 = vadd.f32 %v2620_v12, %v2619_v32  ;;  %v2615_v10 = vrot.slane %v2614_v33, 1  ;;  %v2609_v9 = vadd.f32 %v2608_v18, %v2607_v8 }
 0x26c   : > { %v2081_v35 = vrot.slane %v2048_v16, %v6393_v36  ;;  %v2640_v16 = vadd.f32 %v2639_v15, %v2638_v60  ;;  %v2634_v17 = vrot.slane %v2633_v19, 2  ;;  %v2645_v25 = vmul.f32 0.125, %v2595_v22 }
 0x26d   : > { %v2051_v38 = vpop.permute.xlu0 %2050  ;;  %v2646_v29 = vmul.f32 0.125, %v2602_v26  ;;  %v2647_v44 = vmul.f32 0.125, %v2609_v9  ;;  %v2630_v32 = vadd.f32 %v2629_v41, %v2628_v5 }
 0x26e   : > { %v2085_v42 = vrot.slane %v2051_v38, %v6393_v36  ;;  %v2097_v43 = vsel %vm2096_vm8, %v2081_v35, %v2095_v4  ;;  %v2641_v24 = vrot.slane %v2640_v16, 2  ;;  %v2622_v35 = vrot.slane %v2621_v28, 1  ;;  %v2653_v4 = vld [vmem:[%s639_s18] sm:$0xff] }
 0x26f   : > { %v2635_v37 = vadd.f32 %v2634_v17, %v2633_v19  ;;  %v2616_v38 = vadd.f32 %v2615_v10, %v2614_v33  ;;  %v2656_v49 = vrot.slane %v2653_v4, 2  ;;  %v2658_v60 = vrot.slane %v2653_v4, 4 }
 0x270   : > { %v2099_v52 = vsel %vm2098_vm9, %v2085_v42, %v2097_v43  ;;  %v2642_v42 = vadd.f32 %v2641_v24, %v2640_v16  ;;  %v2655_v43 = vrot.slane %v2653_v4, 1  ;;  %v2623_v45 = vadd.f32 %v2622_v35, %v2621_v28 }
 0x271   : > { %v2101_v1 = vsel %vm1897_vm2, %v2099_v52, -inf  ;;  %v2636_v48 = vrot.slane %v2635_v37, 1  ;;  %v2648_v55 = vmul.f32 0.125, %v2616_v38  ;;  %v2650_v11 = vmul.f32 0.125, %v2630_v32 }
 0x272   : > { %2102 = vmax.xlane.f32.xlu1 %v2101_v1  ;;  %v2643_v52 = vrot.slane %v2642_v42, 1  ;;  %v2657_v1 = vrot.slane %v2653_v4, 3  ;;  %v2649_v59 = vmul.f32 0.125, %v2623_v45  ;;  %v6423_v2 = vadd.f32 %v2655_v43, %v2646_v29 }
 0x273   : > { %v2637_v8 = vadd.f32 %v2636_v48, %v2635_v37  ;;  %v2659_v12 = vrot.slane %v2653_v4, 5  ;;  %v6425_v33 = vadd.f32 %v2653_v4, %v2645_v25  ;;  %v2660_v18 = vrot.slane %v2653_v4, 6 }
 0x274   : > { %v2644_v7 = vadd.f32 %v2643_v52, %v2642_v42  ;;  %v6427_v19 = vadd.f32 %v2656_v49, %v2647_v44  ;;  %v6429_v20 = vadd.f32 %v2657_v1, %v2648_v55  ;;  %v2661_v26 = vrot.slane %v2653_v4, 7 }
 0x275   : > { %v2651_v15 = vmul.f32 0.125, %v2637_v8  ;;  %v6431_v28 = vadd.f32 %v2658_v60, %v2649_v59  ;;  %v6433_v10 = vadd.f32 %v2659_v12, %v2650_v11  ;;  %v2686_v9 = vrot.slane %v6423_v2, 7 }
 0x276   : > { %v2652_v22 = vmul.f32 0.125, %v2644_v7  ;;  %v2688_v17 = vrot.slane %v6427_v19, 6  ;;  %v2690_v5 = vrot.slane %v6429_v20, 5 }
 0x277   : > { %v6435_v16 = vadd.f32 %v2660_v18, %v2651_v15  ;;  %v2692_v25 = vrot.slane %v6431_v28, 4  ;;  %v2687_v29 = vsel %vm2086_vm3, %v2686_v9, %v6425_v33  ;;  %v2694_v35 = vrot.slane %v6433_v10, 3 }
 0x278   : > { %v6440_v24 = vadd.f32 %v2661_v26, %v2652_v22  ;;  %v2689_v37 = vsel %vm2088_vm4, %v2688_v17, %v2687_v29 }
 0x279   : > { %v2696_v4 = vrot.slane %v6435_v16, 2  ;;  %v2691_v38 = vsel %vm2090_vm5, %v2690_v5, %v2689_v37  ;;  %v2373_v37 = vrot.slane %v6244_v53, 4 }
 0x27a   : > { %v2698_v41 = vrot.slane %v6440_v24, 1  ;;  %v2693_v42 = vsel %vm2092_vm6, %v2692_v25, %v2691_v38 }
 0x27b   : > { %v2695_v43 = vsel %vm2094_vm7, %v2694_v35, %v2693_v42  ;;  %v2385_v42 = vrot.slane %v6256_v57, 4 }
 0x27c   : > { %v2697_v44 = vsel %vm2096_vm8, %v2696_v4, %v2695_v43  ;;  %v2379_v4 = vrot.slane %v6247_v54, 4  ;;  %v2391_v43 = vrot.slane %v6259_v58, 4 }
 0x27d   : > { %v2699_v45 = vsel %vm2098_vm9, %v2698_v41, %v2697_v44  ;;  %v2374_v41 = vadd.f32 %v2373_v37, %v6244_v53  ;;  %v2367_v44 = vrot.slane %v6236_v50, 4 }
 0x27e   : > { %v2701_v48 = vsel %vm1897_vm2, %v2699_v45, -inf  ;;  %v2392_v53 = vadd.f32 %v2391_v43, %v6259_v58 }
 0x27f   : > { %2702 = vmax.xlane.f32.xlu1 %v2701_v48  ;;  %v2375_v48 = vrot.slane %v2374_v41, 2 }
 0x2fb   : > { %v2103_v49 = vpop.xlane.xlu1 %2102 }
 0x2fc   : > { %v2108_v32 = vrot.slane %v2103_v49, %v6148_v14  ;;  %v2112_v52 = vrot.slane %v2103_v49, %v6145_v13  ;;  %v2116_v55 = vrot.slane %v2103_v49, %v6175_v21  ;;  %v2120_v60 = vrot.slane %v2103_v49, %v6201_v27 }
 0x2fd   : > { %v2124_v12 = vrot.slane %v2103_v49, %v6180_v23  ;;  %v2128_v22 = vrot.slane %v2103_v49, %v6218_v30 }
 0x2fe   : > { %v2145_v1 = vsub.f32 %v6354_v31, %v2108_v32  ;;  %v2146_v8 = vsub.f32 %v6357_v34, %v2112_v52  ;;  %v2147_v7 = vsub.f32 %v6360_v39, %v2116_v55  ;;  %v2148_v15 = vsub.f32 %v6362_v40, %v2120_v60 }
 0x2ff   : > { %v2149_v26 = vsub.f32 %v6366_v46, %v2124_v12  ;;  %v2132_v34 = vrot.slane %v2103_v49, %v6285_v6  ;;  %v2150_v9 = vsub.f32 %v6368_v47, %v2128_v22  ;;  %v2136_v40 = vrot.slane %v2103_v49, %v6282_v3 }
 0x300   : > { %v2153_v59 = vmul.f32 1.442695, %v2145_v1  ;;  %v2155_v11 = vmul.f32 1.442695, %v2146_v8  ;;  %v2157_v18 = vmul.f32 1.442695, %v2147_v7  ;;  %v2386_v49 = vadd.f32 %v2385_v42, %v6256_v57 }
 0x301   : > { %v2159_v31 = vmul.f32 1.442695, %v2148_v15  ;;  %v2161_v39 = vmul.f32 1.442695, %v2149_v26  ;;  %v2151_v5 = vsub.f32 %v6372_v51, %v2132_v34  ;;  %v2163_v25 = vmul.f32 1.442695, %v2150_v9 }
 0x302   : > { %5521 = vpow2.f32 %v2153_v59  ;;  %v2152_v46 = vsub.f32 %v6374_v56, %v2136_v40  ;;  %v2380_v56 = vadd.f32 %v2379_v4, %v6247_v54  ;;  %v2397_v32 = vrot.slane %v6268_v61, 4 }
 0x303   : > { %5523 = vpow2.f32 %v2155_v11  ;;  %v2165_v47 = vmul.f32 1.442695, %v2151_v5  ;;  %v2403_v55 = vrot.slane %v6271_v62, 4  ;;  %v2368_v54 = vadd.f32 %v2367_v44, %v6236_v50 }
 0x304   : > { %5525 = vpow2.f32 %v2157_v18  ;;  %v2167_v51 = vmul.f32 1.442695, %v2152_v46  ;;  %v2381_v52 = vrot.slane %v2380_v56, 2  ;;  %v2376_v8 = vadd.f32 %v2375_v48, %v2374_v41 }
 0x305   : > { %5527 = vpow2.f32 %v2159_v31  ;;  %v2387_v59 = vrot.slane %v2386_v49, 2  ;;  %v2398_v60 = vadd.f32 %v2397_v32, %v6268_v61  ;;  %v2409_v57 = vrot.slane %v6278_v63, 4 }
 0x306   : > { %5529 = vpow2.f32 %v2161_v39  ;;  %v2382_v7 = vadd.f32 %v2381_v52, %v2380_v56  ;;  %v2393_v11 = vrot.slane %v2392_v53, 2  ;;  %v2404_v12 = vadd.f32 %v2403_v55, %v6271_v62  ;;  %v2423_v39 = vld [vmem:[%s635_s25] sm:$0xff] }
 0x307   : > { %5531 = vpow2.f32 %v2163_v25  ;;  %v2369_v58 = vrot.slane %v2368_v54, 2  ;;  %v2377_v18 = vrot.slane %v2376_v8, 1  ;;  %v2388_v50 = vadd.f32 %v2387_v59, %v2386_v49 }
 0x308   : > { %5533 = vpow2.f32 %v2165_v47  ;;  %v2399_v22 = vrot.slane %v2398_v60, 2  ;;  %v2410_v26 = vadd.f32 %v2409_v57, %v6278_v63  ;;  %v2383_v61 = vrot.slane %v2382_v7, 1 }
 0x309   : > { %5535 = vpow2.f32 %v2167_v51  ;;  %v2394_v31 = vadd.f32 %v2393_v11, %v2392_v53  ;;  %v2405_v34 = vrot.slane %v2404_v12, 2  ;;  %v2370_v62 = vadd.f32 %v2369_v58, %v2368_v54 }
 0x30a   : > { %v2378_v40 = vadd.f32 %v2377_v18, %v2376_v8  ;;  %v2389_v5 = vrot.slane %v2388_v50, 1  ;;  %v2400_v25 = vadd.f32 %v2399_v22, %v2398_v60  ;;  %v2411_v46 = vrot.slane %v2410_v26, 2 }
 0x30b   : > { %v2384_v47 = vadd.f32 %v2383_v61, %v2382_v7  ;;  %v2395_v37 = vrot.slane %v2394_v31, 1  ;;  %v2406_v63 = vadd.f32 %v2405_v34, %v2404_v12  ;;  %v2371_v4 = vrot.slane %v2370_v62, 1 }
 0x30c   : > { %v2425_v51 = vrot.slane %v2423_v39, 1  ;;  %v2416_v41 = vmul.f32 0.125, %v2378_v40  ;;  %v2390_v42 = vadd.f32 %v2389_v5, %v2388_v50  ;;  %v2401_v56 = vrot.slane %v2400_v25, 1 }
 0x30d   : > { %v2412_v43 = vadd.f32 %v2411_v46, %v2410_v26  ;;  %v2426_v44 = vrot.slane %v2423_v39, 2  ;;  %v2417_v48 = vmul.f32 0.125, %v2384_v47  ;;  %v2396_v49 = vadd.f32 %v2395_v37, %v2394_v31 }
 0x30e   : > { %v2407_v32 = vrot.slane %v2406_v63, 1  ;;  %v2372_v52 = vadd.f32 %v2371_v4, %v2370_v62  ;;  %v2427_v53 = vrot.slane %v2423_v39, 3  ;;  %v6515_v55 = vadd.f32 %v2425_v51, %v2416_v41 }
 0x30f   : > { %v6468_v17 = vpop.eup %5521  ;;  %v2418_v54 = vmul.f32 0.125, %v2390_v42  ;;  %v2402_v8 = vadd.f32 %v2401_v56, %v2400_v25  ;;  %v2413_v59 = vrot.slane %v2412_v43, 1  ;;  %v6517_v60 = vadd.f32 %v2426_v44, %v2417_v48 }
 0x310   : > { %2178 = vperm.xlu0 %5487, %v6468_v17   ;;  %v6473_v29 = vpop.eup %5523  ;;  %v2428_v57 = vrot.slane %v2423_v39, 4  ;;  %v2419_v7 = vmul.f32 0.125, %v2396_v49  ;;  %v2408_v11 = vadd.f32 %v2407_v32, %v2406_v63  ;;  %v2415_v12 = vmul.f32 0.125, %v2372_v52 }
 0x311   : > { %v6477_v35 = vpop.eup %5525  ;;  %v2429_v58 = vrot.slane %v2423_v39, 5  ;;  %v2456_v18 = vrot.slane %v6515_v55, 7  ;;  %v6520_v50 = vadd.f32 %v2427_v53, %v2418_v54  ;;  %v2420_v22 = vmul.f32 0.125, %v2402_v8 }
 0x312   : > { %v6482_v38 = vpop.eup %5527  ;;  %v2414_v26 = vadd.f32 %v2413_v59, %v2412_v43  ;;  %v2458_v61 = vrot.slane %v6517_v60, 6  ;;  %v2444_v31 = vadd.f32 %v2428_v57, %v2419_v7  ;;  %v2421_v34 = vmul.f32 0.125, %v2408_v11 }
 0x313   : > { %v6490_v45 = vpop.eup %5529  ;;  %v2430_v62 = vrot.slane %v2423_v39, 6  ;;  %v2440_v40 = vadd.f32 %v2423_v39, %v2415_v12  ;;  %v2431_v5 = vrot.slane %v2423_v39, 7  ;;  %v2460_v25 = vrot.slane %v6520_v50, 5 }
 0x314   : > { %2181 = vperm.xlu0 %5487, %v6473_v29   ;;  %v6498_v1 = vpop.eup %5531  ;;  %v2445_v46 = vadd.f32 %v2429_v58, %v2420_v22  ;;  %v2422_v47 = vmul.f32 0.125, %v2414_v26  ;;  %v2462_v63 = vrot.slane %v2444_v31, 4 }
 0x315   : > { %v6504_v15 = vpop.eup %5533  ;;  %v2457_v37 = vsel %vm2086_vm3, %v2456_v18, %v2440_v40  ;;  %v2446_v4 = vadd.f32 %v2430_v62, %v2421_v34 }
 0x316   : > { %v6512_v9 = vpop.eup %5535  ;;  %v2459_v51 = vsel %vm2088_vm4, %v2458_v61, %v2457_v37  ;;  %v2447_v41 = vadd.f32 %v2431_v5, %v2422_v47  ;;  %v2464_v56 = vrot.slane %v2445_v46, 3 }
 0x317   : > { %v2461_v42 = vsel %vm2090_vm5, %v2460_v25, %v2459_v51  ;;  %v2466_v44 = vrot.slane %v2446_v4, 2 }
 0x318   : > { %2184 = vperm.xlu0 %5487, %v6477_v35   ;;  %v2463_v43 = vsel %vm2092_vm6, %v2462_v63, %v2461_v42  ;;  %v2468_v39 = vrot.slane %v2447_v41, 1 }
 0x319   : > { %v2465_v48 = vsel %vm2094_vm7, %v2464_v56, %v2463_v43 }
 0x31a   : > { %v2467_v49 = vsel %vm2096_vm8, %v2466_v44, %v2465_v48 }
 0x31b   : > { %v2469_v32 = vsel %vm2098_vm9, %v2468_v39, %v2467_v49 }
 0x31c   : > { %2187 = vperm.xlu0 %5487, %v6482_v38   ;;  %v2471_v52 = vsel %vm1897_vm2, %v2469_v32, -inf }
 0x320   : > { %2190 = vperm.xlu0 %5487, %v6490_v45  }
 0x324   : > { %2193 = vperm.xlu0 %5487, %v6498_v1  }
 0x328   : > { %2196 = vperm.xlu0 %5487, %v6504_v15  }
 0x32c   : > { %2199 = vperm.xlu0 %5487, %v6512_v9  }
 0x34b   : > { %2472 = vmax.xlane.f32.xlu0 %v2471_v52 }
 0x38b   : > { %v2179_v53 = vpop.permute.xlu0 %2178 }
 0x38c   : > { %v2204_v58 = vrot.slane %v2179_v53, %v6393_v36 }
 0x38f   : > { %v2182_v54 = vpop.permute.xlu0 %2181 }
 0x390   : > { %v2208_v11 = vrot.slane %v2182_v54, %v6393_v36 }
 0x392   : > { %v2233_v61 = vsel %vm2086_vm3, %v2208_v11, %v2204_v58 }
 0x393   : > { %v2185_v8 = vpop.permute.xlu0 %2184 }
 0x394   : > { %v2212_v12 = vrot.slane %v2185_v8, %v6393_v36 }
 0x396   : > { %v2234_v62 = vsel %vm2088_vm4, %v2212_v12, %v2233_v61 }
 0x397   : > { %v2188_v59 = vpop.permute.xlu0 %2187 }
 0x398   : > { %v2216_v18 = vrot.slane %v2188_v59, %v6393_v36 }
 0x39a   : > { %v2235_v25 = vsel %vm2090_vm5, %v2216_v18, %v2234_v62 }
 0x39b   : > { %v2191_v57 = vpop.permute.xlu0 %2190 }
 0x39c   : > { %v2220_v22 = vrot.slane %v2191_v57, %v6393_v36 }
 0x39e   : > { %v2236_v47 = vsel %vm2092_vm6, %v2220_v22, %v2235_v25 }
 0x39f   : > { %v2194_v7 = vpop.permute.xlu0 %2193 }
 0x3a0   : > { %v2224_v34 = vrot.slane %v2194_v7, %v6393_v36 }
 0x3a2   : > { %v2237_v63 = vsel %vm2094_vm7, %v2224_v34, %v2236_v47 }
 0x3a3   : > { %v2197_v26 = vpop.permute.xlu0 %2196 }
 0x3a4   : > { %v2228_v5 = vrot.slane %v2197_v26, %v6393_v36 }
 0x3a6   : > { %v2238_v42 = vsel %vm2096_vm8, %v2228_v5, %v2237_v63 }
 0x3a7   : > { %v2200_v37 = vpop.permute.xlu0 %2199 }
 0x3a8   : > { %v2232_v51 = vrot.slane %v2200_v37, %v6393_v36 }
 0x3aa   : > { %v2239_v56 = vsel %vm2098_vm9, %v2232_v51, %v2238_v42 }
 0x3ab   : > { %v2241_v43 = vsel %vm1897_vm2, %v2239_v56, 0.0 }
 0x3ac   : > { %2242 = vadd.xlane.f32.xlu1 %v2241_v43 }
 0x3d4   : > { %v2473_v44 = vpop.xlane.xlu0 %2472 }
 0x3d5   : > { %v2475_v48 = vrot.slane %v2473_v44, 1  ;;  %v2476_v39 = vrot.slane %v2473_v44, 2  ;;  %v2477_v49 = vrot.slane %v2473_v44, 3  ;;  %v2478_v32 = vrot.slane %v2473_v44, 4 }
 0x3d6   : > { %v2479_v52 = vrot.slane %v2473_v44, 5  ;;  %v2480_v53 = vrot.slane %v2473_v44, 6  ;;  %v2481_v54 = vrot.slane %v2473_v44, 7  ;;  %v2490_v8 = vsub.f32 %v2440_v40, %v2473_v44 }
 0x3d7   : > { %v2491_v59 = vsub.f32 %v6515_v55, %v2475_v48  ;;  %v2492_v57 = vsub.f32 %v6517_v60, %v2476_v39  ;;  %v2493_v7 = vsub.f32 %v6520_v50, %v2477_v49  ;;  %v2494_v11 = vsub.f32 %v2444_v31, %v2478_v32 }
 0x3d8   : > { %v2495_v12 = vsub.f32 %v2445_v46, %v2479_v52  ;;  %v2496_v58 = vsub.f32 %v2446_v4, %v2480_v53  ;;  %v2498_v18 = vmul.f32 1.442695, %v2490_v8  ;;  %v2497_v34 = vsub.f32 %v2447_v41, %v2481_v54 }
 0x3d9   : > { %v2500_v22 = vmul.f32 1.442695, %v2491_v59  ;;  %v2502_v26 = vmul.f32 1.442695, %v2492_v57  ;;  %v2504_v61 = vmul.f32 1.442695, %v2493_v7  ;;  %v2703_v59 = vpop.xlane.xlu1 %2702 }
 0x3da   : > { %5537 = vpow2.f32 %v2498_v18  ;;  %v2506_v62 = vmul.f32 1.442695, %v2494_v11  ;;  %v2508_v5 = vmul.f32 1.442695, %v2495_v12  ;;  %v2510_v40 = vmul.f32 1.442695, %v2496_v58 }
 0x3db   : > { %5539 = vpow2.f32 %v2500_v22  ;;  %v2512_v55 = vmul.f32 1.442695, %v2497_v34  ;;  %v2705_v58 = vrot.slane %v2703_v59, 1  ;;  %v2706_v34 = vrot.slane %v2703_v59, 2 }
 0x3dc   : > { %5541 = vpow2.f32 %v2502_v26 }
 0x3dd   : > { %5543 = vpow2.f32 %v2504_v61 }
 0x3de   : > { %5545 = vpow2.f32 %v2506_v62  ;;  %v2721_v62 = vsub.f32 %v6423_v2, %v2705_v58 }
 0x3df   : > { %5547 = vpow2.f32 %v2508_v5 }
 0x3e0   : > { %5549 = vpow2.f32 %v2510_v40 }
 0x3e1   : > { %5551 = vpow2.f32 %v2512_v55 }
 0x3e7   : > { %v6551_v60 = vpop.eup %5537 }
 0x3e8   : > { %v6553_v50 = vpop.eup %5539 }
 0x3e9   : > { %v6555_v31 = vpop.eup %5541  ;;  %v2522_v46 = vrot.slane %v6553_v50, 7 }
 0x3ea   : > { %v6558_v4 = vpop.eup %5543  ;;  %v2524_v41 = vrot.slane %v6555_v31, 6 }
 0x3eb   : > { %v6561_v25 = vpop.eup %5545  ;;  %v2523_v47 = vsel %vm2086_vm3, %v2522_v46, %v6551_v60  ;;  %v2526_v37 = vrot.slane %v6558_v4, 5  ;;  %v2708_v46 = vrot.slane %v2703_v59, 4 }
 0x3ec   : > { %v6566_v63 = vpop.eup %5547  ;;  %v2525_v51 = vsel %vm2088_vm4, %v2524_v41, %v2523_v47  ;;  %v2528_v42 = vrot.slane %v6561_v25, 4 }
 0x3ed   : > { %v6570_v56 = vpop.eup %5549  ;;  %v2527_v43 = vsel %vm2090_vm5, %v2526_v37, %v2525_v51  ;;  %v2530_v44 = vrot.slane %v6566_v63, 3  ;;  %v2724_v47 = vsub.f32 %v6431_v28, %v2708_v46  ;;  %v2711_v51 = vrot.slane %v2703_v59, 7 }
 0x3ee   : > { %v6574_v48 = vpop.eup %5551  ;;  %v2529_v39 = vsel %vm2092_vm6, %v2528_v42, %v2527_v43  ;;  %v2532_v49 = vrot.slane %v6570_v56, 2 }
 0x3ef   : > { %v2531_v32 = vsel %vm2094_vm7, %v2530_v44, %v2529_v39  ;;  %v2534_v52 = vrot.slane %v6574_v48, 1  ;;  %v2736_v37 = vmul.f32 1.442695, %v2724_v47 }
 0x3f0   : > { %v2533_v53 = vsel %vm2096_vm8, %v2532_v49, %v2531_v32 }
 0x3f1   : > { %v2535_v54 = vsel %vm2098_vm9, %v2534_v52, %v2533_v53 }
 0x3f2   : > { %v2537_v8 = vsel %vm1897_vm2, %v2535_v54, 0.0 }
 0x3f3   : > { %2538 = vadd.xlane.f32.xlu1 %v2537_v8 }
 0x435   : > { %v2243_v57 = vpop.xlane.xlu1 %2242 }
 0x436   : > { %5553 = vrcp.f32 %v2243_v57 }
 0x443   : > { %v5554_v7 = vpop.eup %5553 }
 0x444   : > { %v2253_v11 = vrot.slane %v5554_v7, %v6145_v13  ;;  %v2249_v12 = vrot.slane %v5554_v7, %v6148_v14  ;;  %v2273_v26 = vrot.slane %v5554_v7, %v6285_v6  ;;  %v2257_v61 = vrot.slane %v5554_v7, %v6175_v21 }
 0x445   : > { %v2277_v14 = vrot.slane %v5554_v7, %v6282_v3  ;;  %v2261_v40 = vrot.slane %v5554_v7, %v6201_v27  ;;  %v2720_v6 = vsub.f32 %v6425_v33, %v2703_v59  ;;  %v2722_v21 = vsub.f32 %v6427_v19, %v2706_v34 }
 0x446   : > { %v2287_v18 = vmul.f32 %v6473_v29, %v2253_v11  ;;  %v2286_v22 = vmul.f32 %v6468_v17, %v2249_v12  ;;  %v2292_v5 = vmul.f32 %v6504_v15, %v2273_v26  ;;  %v2288_v13 = vmul.f32 %v6477_v35, %v2257_v61 }
 0x447   : > { %v2707_v29 = vrot.slane %v2703_v59, 3  ;;  %v2730_v17 = vmul.f32 1.442695, %v2721_v62  ;;  %v2293_v55 = vmul.f32 %v6512_v9, %v2277_v14  ;;  %v2289_v2 = vmul.f32 %v6482_v38, %v2261_v40 }
 0x448   : > { %2306 = vperm.xlu0 %5487, %v2287_v18   ;;  %2303 = vperm.xlu1 %5488, %v2286_v22   ;;  %v2265_v15 = vrot.slane %v5554_v7, %v6180_v23  ;;  %v2709_v27 = vrot.slane %v2703_v59, 5  ;;  %v2732_v3 = vmul.f32 1.442695, %v2722_v21  ;;  %v2728_v41 = vmul.f32 1.442695, %v2720_v6 }
 0x449   : > { %v2723_v35 = vsub.f32 %v6429_v20, %v2707_v29  ;;  %5555 = vpow2.f32 %v2730_v17  ;;  %v2269_v19 = vrot.slane %v5554_v7, %v6218_v30  ;;  %v2710_v38 = vrot.slane %v2703_v59, 6 }
 0x44a   : > { %v2290_v33 = vmul.f32 %v6490_v45, %v2265_v15  ;;  %5557 = vpow2.f32 %v2732_v3  ;;  %v2725_v23 = vsub.f32 %v6433_v10, %v2709_v27  ;;  %v2727_v30 = vsub.f32 %v6440_v24, %v2711_v51 }
 0x44b   : > { %v2734_v9 = vmul.f32 1.442695, %v2723_v35  ;;  %5559 = vpow2.f32 %v2728_v41  ;;  %v2291_v20 = vmul.f32 %v6498_v1, %v2269_v19  ;;  %v2726_v42 = vsub.f32 %v6435_v16, %v2710_v38 }
 0x44c   : > { %2321 = vperm.xlu0 %5487, %v2292_v5   ;;  %2309 = vperm.xlu1 %5488, %v2288_v13   ;;  %v2738_v45 = vmul.f32 1.442695, %v2725_v23  ;;  %v2742_v44 = vmul.f32 1.442695, %v2727_v30  ;;  %v5575_v30 = vld [vmem:[%s6077_s24 + $0x10] sm:$0xff] }
 0x44d   : > { %5561 = vpow2.f32 %v2734_v9  ;;  %v2740_v28 = vmul.f32 1.442695, %v2726_v42 }
 0x44e   : > { %5563 = vpow2.f32 %v2736_v37 }
 0x44f   : > { %5565 = vpow2.f32 %v2738_v45 }
 0x450   : > { %2324 = vperm.xlu0 %5487, %v2293_v55   ;;  %2312 = vperm.xlu1 %5488, %v2289_v2   ;;  %5567 = vpow2.f32 %v2740_v28 }
 0x451   : > { %5569 = vpow2.f32 %v2742_v44  ;;  %v5576_v44 = vld [vmem:[%s6077_s24 + $0x18] sm:$0xff] }
 0x454   : > { %2315 = vperm.xlu1 %5488, %v2290_v33  }
 0x456   : > { %v6607_v43 = vpop.eup %5555 }
 0x457   : > { %v6609_v10 = vpop.eup %5557  ;;  %v2752_v1 = vrot.slane %v6607_v43, 7 }
 0x458   : > { %2318 = vperm.xlu1 %5488, %v2291_v20   ;;  %v6612_v39 = vpop.eup %5559  ;;  %v2754_v16 = vrot.slane %v6609_v10, 6 }
 0x459   : > { %v2753_v24 = vsel %vm2086_vm3, %v2752_v1, %v6612_v39 }
 0x45a   : > { %v6614_v49 = vpop.eup %5561  ;;  %v2755_v53 = vsel %vm2088_vm4, %v2754_v16, %v2753_v24  ;;  %v5577_v16 = vld [vmem:[%s6077_s24 + $0x20] sm:$0xff] }
 0x45b   : > { %v6619_v32 = vpop.eup %5563  ;;  %v2756_v52 = vrot.slane %v6614_v49, 5 }
 0x45c   : > { %v6623_v54 = vpop.eup %5565  ;;  %v2758_v8 = vrot.slane %v6619_v32, 4 }
 0x45d   : > { %v2757_v59 = vsel %vm2090_vm5, %v2756_v52, %v2755_v53  ;;  %v6627_v57 = vpop.eup %5567  ;;  %v2760_v7 = vrot.slane %v6623_v54, 3 }
 0x45e   : > { %v2759_v11 = vsel %vm2092_vm6, %v2758_v8, %v2757_v59  ;;  %v6631_v12 = vpop.eup %5569  ;;  %v2762_v58 = vrot.slane %v6627_v57, 2  ;;  %v5578_v8 = vld [vmem:[%s6077_s24 + $0x28] sm:$0xff] }
 0x45f   : > { %v2761_v18 = vsel %vm2094_vm7, %v2760_v7, %v2759_v11  ;;  %v2764_v22 = vrot.slane %v6631_v12, 1 }
 0x460   : > { %v2763_v26 = vsel %vm2096_vm8, %v2762_v58, %v2761_v18 }
 0x461   : > { %v2765_v61 = vsel %vm2098_vm9, %v2764_v22, %v2763_v26  ;;  %v5579_v22 = vld [vmem:[%s6077_s24 + $0x30] sm:$0xff] }
 0x462   : > { %v2767_v34 = vsel %vm1897_vm2, %v2765_v61, 0.0 }
 0x47c   : > { %2768 = vadd.xlane.f32.xlu1 %v2767_v34  ;;  %v2539_v62 = vpop.xlane.xlu1 %2538 }
 0x47d   : > { %5571 = vrcp.f32 %v2539_v62 }
 0x48a   : > { %v5572_v5 = vpop.eup %5571 }
 0x48b   : > { %v2542_v13 = vrot.slane %v5572_v5, 1  ;;  %v2543_v14 = vrot.slane %v5572_v5, 2  ;;  %v2544_v40 = vrot.slane %v5572_v5, 3  ;;  %v2545_v29 = vrot.slane %v5572_v5, 4 }
 0x48c   : > { %v2546_v6 = vrot.slane %v5572_v5, 5  ;;  %v2547_v21 = vrot.slane %v5572_v5, 6  ;;  %v2548_v15 = vrot.slane %v5572_v5, 7  ;;  %v6652_v35 = vmul.f32 %v5572_v5, %v6551_v60 }
 0x48d   : > { %v6640_v17 = vmul.f32 %v6553_v50, %v2542_v13  ;;  %v6643_v55 = vmul.f32 %v6555_v31, %v2543_v14  ;;  %v6646_v2 = vmul.f32 %v6558_v4, %v2544_v40  ;;  %v6649_v46 = vmul.f32 %v6561_v25, %v2545_v29  ;;  %v5580_v40 = vld [vmem:[%s6077_s24 + $0x38] sm:$0xff]  ;;  %v5581_v29 = vld [vmem:[%s6087_s28] sm:$0xff] }
 0x48e   : > { %v6657_v50 = vmul.f32 %v6566_v63, %v2546_v6  ;;  %v6660_v31 = vmul.f32 %v6570_v56, %v2547_v21  ;;  %v6666_v41 = vmul.f32 %v6574_v48, %v2548_v15  ;;  %v5582_v6 = vld [vmem:[%s6087_s28 + $0x8] sm:$0xff]  ;;  %v5583_v21 = vld [vmem:[%s6087_s28 + $0x10] sm:$0xff]  ;;  %v5584_v15 = vld [vmem:[%s6087_s28 + $0x18] sm:$0xff] }
 0x48f   : > { %v2573_v27 = vrot.slane %v6640_v17, 7  ;;  %v2575_v3 = vrot.slane %v6643_v55, 6  ;;  %v2577_v25 = vrot.slane %v6646_v2, 5  ;;  %v2579_v33 = vrot.slane %v6649_v46, 4 }
 0x490   : > { %v2581_v63 = vrot.slane %v6657_v50, 3  ;;  %v2583_v47 = vrot.slane %v6660_v31, 2  ;;  %v2585_v48 = vrot.slane %v6666_v41, 1 }
 0x491   : > { %v2574_v4 = vsel %vm2086_vm3, %v2573_v27, %v6652_v35  ;;  %v5590_v27 = vld [vmem:[%s6292_s23 + $0x8] sm:$0xff] }
 0x492   : > { %v2576_v60 = vsel %vm2088_vm4, %v2575_v3, %v2574_v4 }
 0x493   : > { %v2578_v19 = vsel %vm2090_vm5, %v2577_v25, %v2576_v60 }
 0x494   : > { %v2580_v56 = vsel %vm2092_vm6, %v2579_v33, %v2578_v19 }
 0x495   : > { %v2582_v9 = vsel %vm2094_vm7, %v2581_v63, %v2580_v56 }
 0x496   : > { %v2584_v38 = vsel %vm2096_vm8, %v2583_v47, %v2582_v9 }
 0x497   : > { %v2586_v23 = vsel %vm2098_vm9, %v2585_v48, %v2584_v38  ;;  %v5591_v48 = vld [vmem:[%s6292_s23 + $0x10] sm:$0xff] }
 0x498   : > { %2588 = vst.msk [vmem:[%s659_s16] sm:$0xff] %vm1897_vm2, %v2586_v23  ;;  %s5815_s16 = smov [#allocation8]  }
 0x499   : > { %s5685_s17 = sshll.u32 %s5815_s16, 4  ;;  %s5686_s17 = int_to_ptr.vmem [resolvable:$false] %s5685_s17 }
 0x49a   : > { %s5687_s22 = scalar_lea.vmem %s5686_s17, 256  ;;  %p5688_p9 = scmp.lt.s32.totalorder %s6860_s27, %s5686_s17 }
 0x49b   : > { %p5689_p6 = scmp.lt.s32.totalorder %s5687_s22, %s5681_s14 }
 0x49d   : > { %p5690_p12 = por %p5689_p6, %p5688_p9 }
 0x49f   : > { %p5691_p0 = pnand %p5690_p12, %p5684_p3 }
 0x4c3   : > { %v2307_v20 = vpop.permute.xlu0 %2306  ;;  %v2304_v37 = vpop.permute.xlu1 %2303 }
 0x4c4   : > { %v2333_v51 = vrot.slane %v2307_v20, %v6393_v36  ;;  %v2329_v42 = vrot.slane %v2304_v37, %v6393_v36 }
 0x4c6   : > { %5299 = vmatmul.mubr.msk.f32.vlgmr.msra.gmra.mxu0 %vm1897_vm2, %v2329_v42  ;;  %5304 = vmatmul.mubr.msk.f32.vlgmr.msra.gmra.mxu1 %vm1897_vm2, %v2333_v51  ;;  %v2358_v7 = vsel %vm2086_vm3, %v2333_v51, %v2329_v42 }
 0x4c7   : > { %v2310_v45 = vpop.permute.xlu1 %2309  ;;  %5307 = vmatpush3.msra.mxu0 %v5575_v30  ;;  %5308 = vmatprep.mubr.msk.f32.mxu0 %vm5813_vm0, %v5812_v0  ;;  %v2322_v52 = vpop.permute.xlu0 %2321  ;;  %v5594_v30 = vld [vmem:[%s6292_s23 + $0x28] sm:$0xff] }
 0x4c8   : > { %v2337_v28 = vrot.slane %v2310_v45, %v6393_v36  ;;  %5312 = vmatpush3.msra.mxu1 %v5576_v44  ;;  %5313 = vmatprep.mubr.msk.f32.mxu1 %vm5813_vm0, %v5812_v0  ;;  %v2353_v26 = vrot.slane %v2322_v52, %v6393_v36 }
 0x4c9   : > { %5316 = vmatprep.subr.mxu0 %v5812_v0  ;;  %5321 = vmatprep.subr.mxu1 %v5812_v0 }
 0x4ca   : > { %5309 = vmatmul.mubr.msk.f32.vlgmr.msra.gmra.mxu0 %vm1897_vm2, %v2337_v28  ;;  %v2359_v11 = vsel %vm2088_vm4, %v2337_v28, %v2358_v7 }
 0x4cb   : > { %v2313_v1 = vpop.permute.xlu1 %2312  ;;  %5317 = vmatpush3.msra.mxu0 %v5577_v16  ;;  %5318 = vmatprep.mubr.msk.f32.mxu0 %vm5813_vm0, %v5812_v0  ;;  %v2325_v58 = vpop.permute.xlu0 %2324  ;;  %v5595_v16 = vld [vmem:[%s6292_s23 + $0x30] sm:$0xff] }
 0x4cc   : > { %v2341_v24 = vrot.slane %v2313_v1, %v6393_v36  ;;  %5326 = vmatprep.subr.mxu0 %v5812_v0  ;;  %v2357_v5 = vrot.slane %v2325_v58, %v6393_v36 }
 0x4ce   : > { %5314 = vmatmul.mubr.msk.f32.vlgmr.msra.gmra.mxu1 %vm1897_vm2, %v2341_v24  ;;  %v2360_v61 = vsel %vm2090_vm5, %v2341_v24, %v2359_v11 }
 0x4cf   : > { %v2316_v53 = vpop.permute.xlu1 %2315  ;;  %5322 = vmatpush3.msra.mxu1 %v5578_v8  ;;  %5323 = vmatprep.mubr.msk.f32.mxu1 %vm5813_vm0, %v5812_v0 }
 0x4d0   : > { %v2345_v59 = vrot.slane %v2316_v53, %v6393_v36  ;;  %5331 = vmatprep.subr.mxu1 %v5812_v0  ;;  %v5596_v53 = vld [vmem:[%s6292_s23 + $0x38] sm:$0xff] }
 0x4d2   : > { %5319 = vmatmul.mubr.msk.f32.vlgmr.msra.gmra.mxu0 %vm1897_vm2, %v2345_v59  ;;  %v2361_v62 = vsel %vm2092_vm6, %v2345_v59, %v2360_v61 }
 0x4d3   : > { %v2319_v18 = vpop.permute.xlu1 %2318  ;;  %5327 = vmatpush3.msra.mxu0 %v5579_v22  ;;  %5328 = vmatprep.mubr.msk.f32.mxu0 %vm5813_vm0, %v5812_v0 }
 0x4d4   : > { %v2349_v34 = vrot.slane %v2319_v18, %v6393_v36  ;;  %5336 = vmatprep.subr.mxu0 %v5812_v0 }
 0x4d6   : > { %v2362_v13 = vsel %vm2094_vm7, %v2349_v34, %v2361_v62  ;;  %5324 = vmatmul.mubr.msk.f32.vlgmr.msra.gmra.mxu1 %vm1897_vm2, %v2349_v34  ;;  %5329 = vmatmul.mubr.msk.f32.vlgmr.msra.gmra.mxu0 %vm1897_vm2, %v2353_v26 }
 0x4d7   : > { %v2363_v14 = vsel %vm2096_vm8, %v2353_v26, %v2362_v13  ;;  %5332 = vmatpush3.msra.mxu1 %v5580_v40  ;;  %5333 = vmatprep.mubr.msk.f32.mxu1 %vm5813_vm0, %v5812_v0 }
 0x4d8   : > { %v2364_v36 = vsel %vm2098_vm9, %v2357_v5, %v2363_v14  ;;  %5337 = vmatpush3.msra.mxu0 %v5581_v29  ;;  %5338 = vmatprep.mubr.msk.f32.mxu0 %vm5813_vm0, %v5812_v0 }
 0x4d9   : > { %2366 = vst.msk [vmem:[%s655_s12] sm:$0xff] %vm1897_vm2, %v2364_v36  ;;  %5341 = vmatprep.subr.mxu1 %v5812_v0  ;;  %5346 = vmatprep.subr.mxu0 %v5812_v0 }
 0x4da   : > { %5334 = vmatmul.mubr.msk.f32.vlgmr.msra.gmra.mxu1 %vm1897_vm2, %v2357_v5  ;;  %5339 = vmatmul.mubr.msk.f32.vlgmr.msra.gmra.mxu0 %vm1897_vm2, %v6652_v35  ;;  %v5585_v35 = vld [vmem:[%s6087_s28 + $0x20] sm:$0xff] }
 0x4db   : > { %5342 = vmatpush3.msra.mxu1 %v5582_v6  ;;  %5343 = vmatprep.mubr.msk.f32.mxu1 %vm5813_vm0, %v5812_v0 }
 0x4dc   : > { %5347 = vmatpush3.msra.mxu0 %v5583_v21  ;;  %5348 = vmatprep.mubr.msk.f32.mxu0 %vm5813_vm0, %v5812_v0 }
 0x4dd   : > { %5351 = vmatprep.subr.mxu1 %v5812_v0  ;;  %5356 = vmatprep.subr.mxu0 %v5812_v0 }
 0x4de   : > { %5344 = vmatmul.mubr.msk.f32.vlgmr.msra.gmra.mxu1 %vm1897_vm2, %v6640_v17  ;;  %5349 = vmatmul.mubr.msk.f32.vlgmr.msra.gmra.mxu0 %vm1897_vm2, %v6643_v55  ;;  %v5586_v17 = vld [vmem:[%s6087_s28 + $0x28] sm:$0xff]  ;;  %v5587_v55 = vld [vmem:[%s6087_s28 + $0x30] sm:$0xff] }
 0x4df   : > { %5352 = vmatpush3.msra.mxu1 %v5584_v15  ;;  %5353 = vmatprep.mubr.msk.f32.mxu1 %vm5813_vm0, %v5812_v0 }
 0x4e0   : > { %5357 = vmatpush3.msra.mxu0 %v5585_v35  ;;  %5358 = vmatprep.mubr.msk.f32.mxu0 %vm5813_vm0, %v5812_v0 }
 0x4e1   : > { %5361 = vmatprep.subr.mxu1 %v5812_v0  ;;  %5366 = vmatprep.subr.mxu0 %v5812_v0 }
 0x4e2   : > { %5354 = vmatmul.mubr.msk.f32.vlgmr.msra.gmra.mxu1 %vm1897_vm2, %v6646_v2  ;;  %5359 = vmatmul.mubr.msk.f32.vlgmr.msra.gmra.mxu0 %vm1897_vm2, %v6649_v46  ;;  %v5588_v2 = vld [vmem:[%s6087_s28 + $0x38] sm:$0xff]  ;;  %v5589_v46 = vld [vmem:[%s6292_s23] sm:$0xff] }
 0x4e3   : > { %5362 = vmatpush3.msra.mxu1 %v5586_v17  ;;  %5363 = vmatprep.mubr.msk.f32.mxu1 %vm5813_vm0, %v5812_v0 }
 0x4e4   : > { %5367 = vmatpush3.msra.mxu0 %v5587_v55  ;;  %5368 = vmatprep.mubr.msk.f32.mxu0 %vm5813_vm0, %v5812_v0 }
 0x4e5   : > { %5371 = vmatprep.subr.mxu1 %v5812_v0  ;;  %5376 = vmatprep.subr.mxu0 %v5812_v0 }
 0x4e6   : > { %5364 = vmatmul.mubr.msk.f32.vlgmr.msra.gmra.mxu1 %vm1897_vm2, %v6657_v50  ;;  %5369 = vmatmul.mubr.msk.f32.vlgmr.msra.gmra.mxu0 %vm1897_vm2, %v6660_v31 }
 0x4e7   : > { %5372 = vmatpush3.msra.mxu1 %v5588_v2  ;;  %5373 = vmatprep.mubr.msk.f32.mxu1 %vm5813_vm0, %v5812_v0 }
 0x4e8   : > { %5377 = vmatpush3.msra.mxu0 %v5589_v46  ;;  %5381 = vmatprep.subr.mxu1 %v5812_v0 }
 0x4e9   : > { %5378 = vmatprep.mubr.msk.f32.mxu0 %vm5813_vm0, %v5812_v0  ;;  %5386 = vmatprep.subr.mxu0 %v5812_v0 }
 0x4ea   : > { %5374 = vmatmul.mubr.msk.f32.vlgmr.msra.gmra.mxu1 %vm1897_vm2, %v6666_v41 }
 0x4eb   : > { %5382 = vmatpush3.msra.mxu1 %v5590_v27  ;;  %5383 = vmatprep.mubr.msk.f32.mxu1 %vm5813_vm0, %v5812_v0 }
 0x4ec   : > { %5391 = vmatprep.subr.mxu1 %v5812_v0 }
 0x505   : > { %v2769_v3 = vpop.xlane.xlu1 %2768 }
 0x506   : > { %5573 = vrcp.f32 %v2769_v3 }
 0x513   : > { %v5574_v50 = vpop.eup %5573 }
 0x514   : > { %v2787_v31 = vmul.f32 %v5574_v50, %v6612_v39  ;;  %v2772_v4 = vrot.slane %v5574_v50, 1  ;;  %v2773_v25 = vrot.slane %v5574_v50, 2  ;;  %v2774_v60 = vrot.slane %v5574_v50, 3 }
 0x515   : > { %v2775_v33 = vrot.slane %v5574_v50, 4  ;;  %v2776_v19 = vrot.slane %v5574_v50, 5  ;;  %v2777_v41 = vrot.slane %v5574_v50, 6  ;;  %v2778_v9 = vrot.slane %v5574_v50, 7 }
 0x516   : > { %5379 = vmatmul.mubr.msk.f32.vlgmr.msra.gmra.mxu0 %vm1897_vm2, %v2787_v31  ;;  %v2788_v63 = vmul.f32 %v6607_v43, %v2772_v4  ;;  %v2789_v56 = vmul.f32 %v6609_v10, %v2773_v25  ;;  %v2790_v47 = vmul.f32 %v6614_v49, %v2774_v60  ;;  %v5592_v10 = vld [vmem:[%s6292_s23 + $0x18] sm:$0xff] }
 0x517   : > { %5387 = vmatpush3.msra.mxu0 %v5591_v48  ;;  %5388 = vmatprep.mubr.msk.f32.mxu0 %vm5813_vm0, %v5812_v0  ;;  %v2791_v39 = vmul.f32 %v6619_v32, %v2775_v33  ;;  %v2792_v43 = vmul.f32 %v6623_v54, %v2776_v19  ;;  %v2793_v49 = vmul.f32 %v6627_v57, %v2777_v41  ;;  %v5593_v54 = vld [vmem:[%s6292_s23 + $0x20] sm:$0xff]  ;;  %s6850_s23 = sshll.u32 %s5909_s29, 7 }
 0x518   : > { %v2803_v38 = vrot.slane %v2788_v63, 7  ;;  %5384 = vmatmul.mubr.msk.f32.vlgmr.msra.gmra.mxu1 %vm1897_vm2, %v2788_v63  ;;  %v2805_v23 = vrot.slane %v2789_v56, 6  ;;  %5396 = vmatprep.subr.mxu0 %v5812_v0  ;;  %v2807_v32 = vrot.slane %v2790_v47, 5  ;;  %v2794_v37 = vmul.f32 %v6631_v12, %v2778_v9  ;;  %s6858_s25 = scalar_lea.hbm %s7028_s1, %s6850_s23 }
 0x519   : > { %5392 = vmatpush3.msra.mxu1 %v5592_v10  ;;  %5393 = vmatprep.mubr.msk.f32.mxu1 %vm5813_vm0, %v5812_v0  ;;  %v2809_v42 = vrot.slane %v2791_v39, 4  ;;  %v2811_v45 = vrot.slane %v2792_v43, 3  ;;  %v2813_v28 = vrot.slane %v2793_v49, 2 }
 0x51a   : > { %v2804_v20 = vsel %vm2086_vm3, %v2803_v38, %v2787_v31  ;;  %5389 = vmatmul.mubr.msk.f32.vlgmr.msra.gmra.mxu0 %vm1897_vm2, %v2789_v56  ;;  %5401 = vmatprep.subr.mxu1 %v5812_v0  ;;  %v2815_v1 = vrot.slane %v2794_v37, 1 }
 0x51b   : > { %v2806_v51 = vsel %vm2088_vm4, %v2805_v23, %v2804_v20  ;;  %5397 = vmatpush3.msra.mxu0 %v5593_v54  ;;  %5398 = vmatprep.mubr.msk.f32.mxu0 %vm5813_vm0, %v5812_v0 }
 0x51c   : > { %v2808_v57 = vsel %vm2090_vm5, %v2807_v32, %v2806_v51  ;;  %5394 = vmatmul.mubr.msk.f32.vlgmr.msra.gmra.mxu1 %vm1897_vm2, %v2790_v47  ;;  %5406 = vmatprep.subr.mxu0 %v5812_v0 }
 0x51d   : > { %5402 = vmatpush3.msra.mxu1 %v5594_v30  ;;  %v2810_v12 = vsel %vm2092_vm6, %v2809_v42, %v2808_v57  ;;  %5403 = vmatprep.mubr.msk.f32.mxu1 %vm5813_vm0, %v5812_v0 }
 0x51e   : > { %5399 = vmatmul.mubr.msk.f32.vlgmr.msra.gmra.mxu0 %vm1897_vm2, %v2791_v39  ;;  %v2812_v44 = vsel %vm2094_vm7, %v2811_v45, %v2810_v12  ;;  %5411 = vmatprep.subr.mxu1 %v5812_v0 }
 0x51f   : > { %5407 = vmatpush3.msra.mxu0 %v5595_v16  ;;  %5408 = vmatprep.mubr.msk.f32.mxu0 %vm5813_vm0, %v5812_v0  ;;  %v2814_v24 = vsel %vm2096_vm8, %v2813_v28, %v2812_v44 }
 0x520   : > { %5404 = vmatmul.mubr.msk.f32.vlgmr.msra.gmra.mxu1 %vm1897_vm2, %v2792_v43  ;;  %v2816_v52 = vsel %vm2098_vm9, %v2815_v1, %v2814_v24 }
 0x521   : > { %5412 = vmatpush3.msra.mxu1 %v5596_v53  ;;  %5413 = vmatprep.mubr.msk.f32.mxu1 %vm5813_vm0, %v5812_v0  ;;  %2818 = vst.msk [vmem:[%s663_s20] sm:$0xff] %vm1897_vm2, %v2816_v52 }
 0x522   : > { %5409 = vmatmul.mubr.msk.f32.vlgmr.msra.gmra.mxu0 %vm1897_vm2, %v2793_v49 }
 0x524   : > { %5414 = vmatmul.mubr.msk.f32.vlgmr.msra.gmra.mxu1 %vm1897_vm2, %v2794_v37 }
 0x586   : > { %v2887_v8 = vpop.f32.mrf.mxu0  ;;  %v2959_v59 = vpop.f32.mrf.mxu1 }
 0x587   : > { %v3403_v61 = vrot.slane %v2959_v59, 7 }
 0x588   : > { %v5300_v7 = vpop.f32.mrf.mxu0  ;;  %v5305_v11 = vpop.f32.mrf.mxu1 }
 0x589   : > { %v3404_v14 = vsel %vm2086_vm3, %v3403_v61, %v2887_v8 }
 0x58a   : > { %v3031_v58 = vpop.f32.mrf.mxu0 }
 0x58b   : > { %v3405_v34 = vrot.slane %v3031_v58, 6 }
 0x58c   : > { %v5310_v18 = vpop.f32.mrf.mxu0 }
 0x58d   : > { %v3406_v40 = vsel %vm2088_vm4, %v3405_v34, %v3404_v14 }
 0x58e   : > { %v3103_v22 = vpop.f32.mrf.mxu1 }
 0x58f   : > { %v3407_v0 = vrot.slane %v3103_v22, 5 }
 0x590   : > { %v5315_v26 = vpop.f32.mrf.mxu1 }
 0x591   : > { %v3408_v6 = vsel %vm2090_vm5, %v3407_v0, %v3406_v40 }
 0x592   : > { %v3175_v62 = vpop.f32.mrf.mxu0 }
 0x593   : > { %v3409_v5 = vrot.slane %v3175_v62, 4 }
 0x594   : > { %v5320_v13 = vpop.f32.mrf.mxu0 }
 0x595   : > { %v3410_v15 = vsel %vm2092_vm6, %v3409_v5, %v3408_v6 }
 0x596   : > { %v3247_v36 = vpop.f32.mrf.mxu1  ;;  %v3319_v29 = vpop.f32.mrf.mxu0 }
 0x597   : > { %v3411_v21 = vrot.slane %v3247_v36, 3  ;;  %v3413_v35 = vrot.slane %v3319_v29, 2 }
 0x598   : > { %v5325_v17 = vpop.f32.mrf.mxu1  ;;  %v5330_v55 = vpop.f32.mrf.mxu0 }
 0x599   : > { %v3412_v2 = vsel %vm2094_vm7, %v3411_v21, %v3410_v15 }
 0x59a   : > { %v3391_v46 = vpop.f32.mrf.mxu1  ;;  %v3487_v27 = vpop.f32.mrf.mxu0  ;;  %v3414_v50 = vsel %vm2096_vm8, %v3413_v35, %v3412_v2 }
 0x59b   : > { %v3415_v3 = vrot.slane %v3391_v46, 1 }
 0x59c   : > { %v5335_v31 = vpop.f32.mrf.mxu1  ;;  %v5340_v4 = vpop.f32.mrf.mxu0 }
 0x59d   : > { %v3416_v25 = vsel %vm2098_vm9, %v3415_v3, %v3414_v50 }
 0x59e   : > { %v3559_v60 = vpop.f32.mrf.mxu1  ;;  %v3631_v33 = vpop.f32.mrf.mxu0  ;;  %3418 = vst.msk [vmem:[%s610_s13] sm:$0xff] %vm688_vm1, %v3416_v25 }
 0x59f   : > { %v4003_v19 = vrot.slane %v3559_v60, 7 }
 0x5a0   : > { %5694 = shalt.err (!%p5691_p0)
}
 0x5a1   : > { %s5695_s12 = scalar_lea.hbm %s6858_s25, 128  ;;  %s5699_s28 = scalar_lea.hbm %s7028_s1, 256 }
 0x5a2   : > { %p5696_p11 = scmp.ne.s32.totalorder %s6858_s25, %s5695_s12  ;;  %p5700_p5 = scmp.lt.s32.totalorder %s6858_s25, %s7028_s1 }
 0x5a3   : > { %p5701_p13 = scmp.lt.s32.totalorder %s5699_s28, %s5695_s12 }
 0x5a4   : > { %p5697_p4 = pnand %p5696_p11, %p7029_p10 }
 0x5a5   : > { %p5702_p7 = por %p5701_p13, %p5700_p5 }
 0x5a6   : > { %p5698_p2 = pneg %p5697_p4 }
 0x5a8   : > { %p5703_p8 = pnand %p5702_p7, %p5698_p2 }
 0x5aa   : > { %5706 = shalt.err (!%p5703_p8)
}
 0x5ab   : > { %5422 = dma.vmem_to_hbm [thread:$0]  (%p7029_p10), %s6860_s27, 128, %s6858_s25, %s4642_s19   ;;  %v4005_v41 = vrot.slane %v3631_v33, 6  ;;  %v5345_v63 = vpop.f32.mrf.mxu1  ;;  %v5350_v56 = vpop.f32.mrf.mxu0  ;;  %v4004_v47 = vsel %vm2086_vm3, %v4003_v19, %v3487_v27 }
 0x5ac   : > { %s617_s27 = scalar_lea.vmem [#allocation9], %s6843_s11  ;;  %s7030_s19 = sld [smem:[#allocation26_spill]] }
 0x5ad   : > { %v3703_v9 = vpop.f32.mrf.mxu1  ;;  %v3775_v48 = vpop.f32.mrf.mxu0  ;;  %v4006_v38 = vsel %vm2088_vm4, %v4005_v41, %v4004_v47  ;;  %s4695_s18 = sshll.u32 %s617_s27, 4  ;;  %s6902_s16 = scalar_lea.sflag [#allocation10], %s515_s21  ;;  %s4696_s18 = int_to_ptr.vmem [resolvable:$true] %s4695_s18 }
 0x5ae   : > { %v4007_v39 = vrot.slane %v3703_v9, 5  ;;  %v4009_v23 = vrot.slane %v3775_v48, 4  ;;  %s5707_s17 = scalar_lea.vmem %s4696_s18, 128  ;;  %s5816_s22 = smov [#allocation9]  }
 0x5af   : > { %v5355_v43 = vpop.f32.mrf.mxu1  ;;  %v5360_v10 = vpop.f32.mrf.mxu0  ;;  %p5708_p1 = scmp.ne.s32.totalorder %s4696_s18, %s5707_s17  ;;  %s5711_s12 = sshll.u32 %s5816_s22, 4  ;;  %s5712_s12 = int_to_ptr.vmem [resolvable:$false] %s5711_s12 }
 0x5b0   : > { %v4008_v49 = vsel %vm2090_vm5, %v4007_v39, %v4006_v38  ;;  %s5713_s0 = scalar_lea.vmem %s5712_s12, 256  ;;  %p5714_p6 = scmp.lt.s32.totalorder %s4696_s18, %s5712_s12 }
 0x5b1   : > { %v3847_v20 = vpop.f32.mrf.mxu1  ;;  %v3919_v32 = vpop.f32.mrf.mxu0  ;;  %v4010_v51 = vsel %vm2092_vm6, %v4009_v23, %v4008_v49  ;;  %p5709_p3 = pnand %p5708_p1, %p7029_p10  ;;  %p5715_p12 = scmp.lt.s32.totalorder %s5713_s0, %s5707_s17 }
 0x5b2   : > { %v4011_v37 = vrot.slane %v3847_v20, 3  ;;  %v4013_v54 = vrot.slane %v3919_v32, 2  ;;  %s6896_s14 = scalar_lea.hbm %s7030_s19, %s6850_s23 }
 0x5b3   : > { %v5365_v42 = vpop.f32.mrf.mxu1  ;;  %v5370_v57 = vpop.f32.mrf.mxu0  ;;  %p5710_p9 = pneg %p5709_p3  ;;  %p5716_p0 = por %p5715_p12, %p5714_p6 }
 0x5b4   : > { %v4012_v45 = vsel %vm2094_vm7, %v4011_v37, %v4010_v51 }
 0x5b5   : > { %v3991_v30 = vpop.f32.mrf.mxu1  ;;  %v4014_v28 = vsel %vm2096_vm8, %v4013_v54, %v4012_v45  ;;  %p5717_p11 = pnand %p5716_p0, %p5710_p9 }
 0x5b6   : > { %v4015_v12 = vrot.slane %v3991_v30, 1 }
 0x5b7   : > { %v5375_v44 = vpop.f32.mrf.mxu1 }
 0x5b8   : > { %v4016_v1 = vsel %vm2098_vm9, %v4015_v12, %v4014_v28 }
 0x5b9   : > { %4018 = vst.msk [vmem:[%s617_s27] sm:$0xff] %vm688_vm1, %v4016_v1 }
 0x5ba   : > { %5720 = shalt.err (!%p5717_p11)
}
 0x5bb   : > { %s5721_s29 = scalar_lea.hbm %s6896_s14, 128  ;;  %s5725_s28 = scalar_lea.hbm %s7030_s19, 256 }
 0x5bc   : > { %p5722_p4 = scmp.ne.s32.totalorder %s6896_s14, %s5721_s29  ;;  %p5726_p13 = scmp.lt.s32.totalorder %s6896_s14, %s7030_s19 }
 0x5bd   : > { %p5727_p7 = scmp.lt.s32.totalorder %s5725_s28, %s5721_s29 }
 0x5be   : > { %p5723_p2 = pnand %p5722_p4, %p7029_p10 }
 0x5bf   : > { %p5728_p8 = por %p5727_p7, %p5726_p13 }
 0x5c0   : > { %p5724_p5 = pneg %p5723_p2 }
 0x5c2   : > { %p5729_p1 = pnand %p5728_p8, %p5724_p5 }
 0x5c4   : > { %5732 = shalt.err (!%p5729_p1)
}
 0x5c5   : > { %5423 = dma.vmem_to_hbm [thread:$0]  (%p7029_p10), %s4696_s18, 128, %s6896_s14, %s6902_s16  }
 0x5c6   : > { %s624_s27 = scalar_lea.vmem [#allocation11], %s6843_s11  ;;  %s7031_s14 = sld [smem:[#allocation27_spill]] }
 0x5c7   : > { %s4708_s18 = sshll.u32 %s624_s27, 4  ;;  %s5817_s11 = smov [#allocation11]   ;;  %s4709_s18 = int_to_ptr.vmem [resolvable:$true] %s4708_s18 }
 0x5c8   : > { %s5733_s22 = scalar_lea.vmem %s4709_s18, 128  ;;  %s5737_s12 = sshll.u32 %s5817_s11, 4  ;;  %s5738_s12 = int_to_ptr.vmem [resolvable:$false] %s5737_s12 }
 0x5c9   : > { %p5734_p3 = scmp.ne.s32.totalorder %s4709_s18, %s5733_s22  ;;  %s5739_s0 = scalar_lea.vmem %s5738_s12, 256 }
 0x5ca   : > { %p5740_p12 = scmp.lt.s32.totalorder %s4709_s18, %s5738_s12  ;;  %p5741_p0 = scmp.lt.s32.totalorder %s5739_s0, %s5733_s22 }
 0x5cb   : > { %p5735_p9 = pnand %p5734_p3, %p7029_p10 }
 0x5cc   : > { %s4706_s17 = scalar_lea.hbm %s7031_s14, %s6850_s23  ;;  %p5742_p11 = por %p5741_p0, %p5740_p12 }
 0x5cd   : > { %p5736_p6 = pneg %p5735_p9 }
 0x5cf   : > { %p5743_p4 = pnand %p5742_p11, %p5736_p6 }
 0x5d6   : > { %v4087_v16 = vpop.f32.mrf.mxu0 }
 0x5d8   : > { %v5380_v24 = vpop.f32.mrf.mxu0  ;;  %v4159_v52 = vpop.f32.mrf.mxu1 }
 0x5d9   : > { %v4603_v53 = vrot.slane %v4159_v52, 7 }
 0x5da   : > { %v5385_v8 = vpop.f32.mrf.mxu1  ;;  %v4231_v59 = vpop.f32.mrf.mxu0 }
 0x5db   : > { %v4604_v7 = vsel %vm2086_vm3, %v4603_v53, %v4087_v16  ;;  %v4605_v11 = vrot.slane %v4231_v59, 6 }
 0x5dc   : > { %v5390_v58 = vpop.f32.mrf.mxu0  ;;  %v4303_v18 = vpop.f32.mrf.mxu1 }
 0x5dd   : > { %v4606_v22 = vsel %vm2088_vm4, %v4605_v11, %v4604_v7  ;;  %v4607_v26 = vrot.slane %v4303_v18, 5 }
 0x5de   : > { %v5395_v61 = vpop.f32.mrf.mxu1  ;;  %v4375_v34 = vpop.f32.mrf.mxu0 }
 0x5df   : > { %v4608_v62 = vsel %vm2090_vm5, %v4607_v26, %v4606_v22  ;;  %v4609_v0 = vrot.slane %v4375_v34, 4 }
 0x5e0   : > { %v5400_v5 = vpop.f32.mrf.mxu0  ;;  %v4447_v13 = vpop.f32.mrf.mxu1 }
 0x5e1   : > { %v4610_v14 = vsel %vm2092_vm6, %v4609_v0, %v4608_v62  ;;  %v4611_v40 = vrot.slane %v4447_v13, 3 }
 0x5e2   : > { %v5405_v36 = vpop.f32.mrf.mxu1  ;;  %v4519_v29 = vpop.f32.mrf.mxu0 }
 0x5e3   : > { %v4612_v6 = vsel %vm2094_vm7, %v4611_v40, %v4610_v14  ;;  %v4613_v21 = vrot.slane %v4519_v29, 2 }
 0x5e4   : > { %v5410_v15 = vpop.f32.mrf.mxu0  ;;  %v4591_v35 = vpop.f32.mrf.mxu1 }
 0x5e5   : > { %v4614_v17 = vsel %vm2096_vm8, %v4613_v21, %v4612_v6  ;;  %v4615_v55 = vrot.slane %v4591_v35, 1 }
 0x5e6   : > { %v5415_v2 = vpop.f32.mrf.mxu1 }
 0x5e7   : > { %v4616_v46 = vsel %vm2098_vm9, %v4615_v55, %v4614_v17 }
 0x5e8   : > { %4618 = vst.msk [vmem:[%s624_s27] sm:$0xff] %vm688_vm1, %v4616_v46 }
 0x5e9   : > { %5746 = shalt.err (!%p5743_p4)
}
 0x5ea   : > { %s5747_s23 = scalar_lea.hbm %s4706_s17, 128  ;;  %s5751_s24 = scalar_lea.hbm %s7031_s14, 256 }
 0x5eb   : > { %p5748_p2 = scmp.ne.s32.totalorder %s4706_s17, %s5747_s23  ;;  %p5752_p7 = scmp.lt.s32.totalorder %s4706_s17, %s7031_s14 }
 0x5ec   : > { %p5753_p8 = scmp.lt.s32.totalorder %s5751_s24, %s5747_s23 }
 0x5ed   : > { %p5749_p5 = pnand %p5748_p2, %p7029_p10 }
 0x5ee   : > { %p5754_p1 = por %p5753_p8, %p5752_p7 }
 0x5ef   : > { %p5750_p13 = pneg %p5749_p5 }
 0x5f1   : > { %p5755_p3 = pnand %p5754_p1, %p5750_p13 }
 0x5f3   : > { %5758 = shalt.err (!%p5755_p3)
}
 0x5f4   : > { %5424 = dma.vmem_to_hbm [thread:$0]  (%p7029_p10), %s4709_s18, 128, %s4706_s17, %s6902_s16  }
 0x5f5 PF: > { %s7032_s13 = sld [smem:[#allocation16_spill]] }
 0x5f6   : > { %s7033_s27 = sld [smem:[#allocation22_spill]] }
 0x5f7   : > { %s7034_s30 = sld [smem:[#allocation18_spill]] }
 0x5fb   : > { %s4757_s25 = sand.u32 1, %s7032_s13  }
 0x5fc   : > { %p7035_p9 = scmp.ne.s32.totalorder %s7033_s27, 0  ;;  %s4758_s22 = scalar_lea.sflag [#allocation4], %s4757_s25 }
 0x5fd   : > { %p7036_p6 = scmp.ge.s32.totalorder %s7034_s30, 2 }
 0x5ff   : > { %p5439_p12 = pnand %p7036_p6, %p7035_p9 }
 0x601   : > { %p5440_p0 = pneg %p5439_p12 }
 0x603   : > { %5784 = dma.done.wait (%p5440_p0), %s4758_s22, 128  }
 0x604   : > { %5786 = vsyncadd (%p5440_p0), %s4758_s22, 4294967168  ;;  %s7037_s11 = sadd.s32 4294967294, %s7034_s30  }
 0x605   : > { %s4766_s12 = sand.u32 1, %s7037_s11  }
 0x606   : > { %s4767_s0 = scalar_lea.sflag [#allocation10], %s4766_s12 }
 0x607   : > { %5788 = dma.done.wait (%p5440_p0), %s4767_s0, 256  }
 0x608   : > { %5790 = vsyncadd (%p5440_p0), %s4767_s0, 4294967040  ;;  %s7038_s28 = sld [smem:[#allocation19_spill]]  ;;  %s7041_s25 = smov %s5797_s26 }
 0x609   : > { %s7039_s15 = sld [smem:[#allocation17_spill]] }
 0x60a   : > { %s7040_s27 = sld [smem:[#allocation20_spill]] }
 0x60e   : > { %p33_p10 = scmp.ge.s32.totalorder %s7038_s28, 4  }
 0x60f   : > { %s7042_s26 = smov %s7039_s15 }
 0x610   :  { %35 = sbr.rel (!%p33_p10) target bundleno = 15 (0xf), region = 214 }
 0x615   :  { %4781 = vsyncpa [#allocation3], 1 }
 0x616   :  { %4783 = vsyncpa [#allocation3 + $0x1], 1 }
 0x617   :  { %4784 = vsyncpa [#allocation6], 1 }
 0x618   :  { %4786 = vsyncpa [#allocation6 + $0x1], 1 }
 0x619   :  { %4787 = vsyncpa [#allocation4], 1 }
 0x61a   :  { %4789 = vsyncpa [#allocation4 + $0x1], 1 }
 0x61b   :  { %4790 = vsyncpa [#allocation10], 1 }
 0x61c   :  { %4792 = vsyncpa [#allocation10 + $0x1], 1 }

</bundles_post_ra>
